<compile_context>
chip_gen: v7x
topology: tpu7x:2x2x1
jax: 0.10.0
libtpu: 0.0.40
codegen_flags: <defaults>
</compile_context>

<pallas_src>
import jax
import jax.numpy as jnp
import numpy as np
from jax.experimental import pallas as pl
from jax.experimental.pallas import tpu as pltpu

Z = 32                       # latent dim (args.z)
H = 256                      # hidden width
W_OUT = 16 * 32 * 3 * 3      # 4608
OUT = W_OUT + 32             # 4640
N_TILES = 2                  # grid tiles over linear3 columns (megacore on v7x)
TILE_N = 19 * 128            # 2432 (lane-dense)
OUT_PAD = N_TILES * TILE_N   # 4864
BN_EPS = 1e-5


def _generator_kernel(x_ref,
                      w1_ref, b1_ref, g1_ref, be1_ref,
                      w2_ref, b2_ref, g2_ref, be2_ref,
                      w3_ref, b3_ref,
                      out_ref):
    """One output-column tile: full layer-1/2 path (tiny) + its slice of linear3."""
    batch = x_ref.shape[0]
    inv_b = 1.0 / batch

    def bn_relu(h, g_ref, be_ref):
        # One-pass batch stats (training-mode BatchNorm1d, biased variance).
        s1 = jnp.sum(h, axis=0, keepdims=True)
        s2 = jnp.sum(h * h, axis=0, keepdims=True)
        mu = s1 * inv_b
        var = jnp.maximum(s2 * inv_b - mu * mu, 0.0)
        h = (h - mu) * jax.lax.rsqrt(var + BN_EPS)
        return jnp.maximum(h * g_ref[...] + be_ref[...], 0.0)

    # ---- linear1 + BN1 + relu ---- (bf16 operands, f32 accumulation)
    x = x_ref[...].astype(jnp.bfloat16)
    h = jnp.dot(x, w1_ref[...], preferred_element_type=jnp.float32) + b1_ref[...]
    h = bn_relu(h, g1_ref, be1_ref)

    # ---- linear2 + BN2 + relu ----
    h = jnp.dot(h.astype(jnp.bfloat16), w2_ref[...],
                preferred_element_type=jnp.float32) + b2_ref[...]
    h = bn_relu(h, g2_ref, be2_ref)

    # ---- linear3 (this column tile) ----
    y = jnp.dot(h.astype(jnp.bfloat16), w3_ref[...],
                preferred_element_type=jnp.float32)
    out_ref[...] = y + b3_ref[...]


@jax.jit
def generator_w4_forward(x, params, noise_key):
    """Adds the input noise, runs the Pallas kernel, slices/reshapes the outputs."""
    B = x.shape[0]
    # x = zeros_like(x).normal_(0, 0.01) + x
    # TODO(synk): could fuse via pltpu.prng_seed/stateful_normal; kept in the
    # wrapper (deterministic key) so the pure-JAX reference check is exact.
    x = x + 0.01 * jax.random.normal(noise_key, x.shape, dtype=x.dtype)

    full = lambda shape: pl.BlockSpec(shape, lambda j: (0, 0))
    grid_spec = pltpu.PrefetchScalarGridSpec(
        num_scalar_prefetch=0,
        grid=(N_TILES,),
        in_specs=[
            full((B, Z)),                                   # x
            full((Z, H)), full((1, H)), full((1, H)), full((1, H)),   # w1,b1,g1,be1
            full((H, H)), full((1, H)), full((1, H)), full((1, H)),   # w2,b2,g2,be2
            pl.BlockSpec((H, TILE_N), lambda j: (0, j)),    # w3 column tile
            pl.BlockSpec((1, TILE_N), lambda j: (0, j)),    # b3 column tile
        ],
        out_specs=pl.BlockSpec((B, TILE_N), lambda j: (0, j)),
    )

    y = pl.pallas_call(
        _generator_kernel,
        out_shape=jax.ShapeDtypeStruct((B, OUT_PAD), jnp.float32),
        grid_spec=grid_spec,
        compiler_params=pltpu.CompilerParams(
            dimension_semantics=("parallel",),
            vmem_limit_bytes=16 << 20,
        ),
    )(
        x,
        params["w1"], params["b1"], params["g1"], params["be1"],
        params["w2"], params["b2"], params["g2"], params["be2"],
        params["w3"], params["b3"],
    )

    y = y[:, :OUT]                                  # drop lane padding
    w = y[:, :W_OUT].reshape(-1, 32, 16, 3, 3)
    b = y[:, W_OUT:].reshape(-1, 32)
    return w, b


def init_params(key):
    """Deterministic parameter init (shapes match the PyTorch module, bias=True).

    Linear weights are stored in bf16 (W stored as (in, out) == W_torch.T);
    linear3 is zero-padded on the output axis to OUT_PAD for lane-dense tiling.
    """
    ks = jax.random.split(key, 6)

    def linear(kw, kb, fan_in, fan_out):
        bound = 1.0 / np.sqrt(fan_in)
        w = jax.random.uniform(kw, (fan_in, fan_out), jnp.float32, -bound, bound)
        b = jax.random.uniform(kb, (1, fan_out), jnp.float32, -bound, bound)
        return w, b

    w1, b1 = linear(ks[0], ks[1], Z, H)
    w2, b2 = linear(ks[2], ks[3], H, H)
    w3, b3 = linear(ks[4], ks[5], H, OUT)
    w3 = jnp.pad(w3, ((0, 0), (0, OUT_PAD - OUT)))
    b3 = jnp.pad(b3, ((0, 0), (0, OUT_PAD - OUT)))
    return {
        "w1": w1.astype(jnp.bfloat16), "b1": b1,
        "g1": jnp.ones((1, H), jnp.float32), "be1": jnp.zeros((1, H), jnp.float32),
        "w2": w2.astype(jnp.bfloat16), "b2": b2,
        "g2": jnp.ones((1, H), jnp.float32), "be2": jnp.zeros((1, H), jnp.float32),
        "w3": w3.astype(jnp.bfloat16), "b3": b3,
    }


def _reference(x, params, noise_key):
    """Pure-JAX reference (same bf16 weight storage, classic two-pass BatchNorm)."""
    x = x + 0.01 * jax.random.normal(noise_key, x.shape, dtype=x.dtype)

    def lin(a, w, b):
        return jnp.dot(a.astype(jnp.bfloat16), w,
                       preferred_element_type=jnp.float32) + b

    def bn_relu(h, g, be):
        mu = jnp.mean(h, axis=0, keepdims=True)
        var = jnp.mean((h - mu) ** 2, axis=0, keepdims=True)   # biased (PyTorch fwd)
        return jnp.maximum((h - mu) / jnp.sqrt(var + BN_EPS) * g + be, 0.0)

    h = bn_relu(lin(x, params["w1"], params["b1"]), params["g1"], params["be1"])
    h = bn_relu(lin(h, params["w2"], params["b2"]), params["g2"], params["be2"])
    y = lin(h, params["w3"], params["b3"])[:, :OUT]
    return (y[:, :W_OUT].reshape(-1, 32, 16, 3, 3),
            y[:, W_OUT:].reshape(-1, 32))


if __name__ == "__main__":
    key = jax.random.PRNGKey(0)
    k_param, k_x, k_noise = jax.random.split(key, 3)

    B = 8
    x = jax.random.normal(k_x, (B, Z), dtype=jnp.float32)
    params = init_params(k_param)

    w, b = generator_w4_forward(x, params, k_noise)
    jax.block_until_ready((w, b))

    assert w.shape == (B, 32, 16, 3, 3) and b.shape == (B, 32)

    w_ref, b_ref = _reference(x, params, k_noise)
    np.testing.assert_allclose(np.asarray(w), np.asarray(w_ref), rtol=2e-3, atol=2e-4)
    np.testing.assert_allclose(np.asarray(b), np.asarray(b_ref), rtol=2e-3, atol=2e-4)

    print("KERNEL_OK")
</pallas_src>

<mosaic_0001>
module attributes {stable_mosaic.version = 11 : i64} {
  func.func @_generator_kernel(%arg0: i32, %arg1: memref<8x32xf32, #tpu.memory_space<vmem>>, %arg2: memref<32x256xbf16, #tpu.memory_space<vmem>>, %arg3: memref<1x256xf32, #tpu.memory_space<vmem>>, %arg4: memref<1x256xf32, #tpu.memory_space<vmem>>, %arg5: memref<1x256xf32, #tpu.memory_space<vmem>>, %arg6: memref<256x256xbf16, #tpu.memory_space<vmem>>, %arg7: memref<1x256xf32, #tpu.memory_space<vmem>>, %arg8: memref<1x256xf32, #tpu.memory_space<vmem>>, %arg9: memref<1x256xf32, #tpu.memory_space<vmem>>, %arg10: memref<256x2432xbf16, #tpu.memory_space<vmem>>, %arg11: memref<1x2432xf32, #tpu.memory_space<vmem>>, %arg12: memref<8x2432xf32, #tpu.memory_space<vmem>>) attributes {dimension_semantics = [#tpu.dimension_semantics<parallel>], iteration_bounds = array<i64: 2>, scalar_prefetch = 0 : i64, scratch_operands = 0 : i64, tpu.core_type = #tpu.core_type<tc>, window_params = [{pipeline_mode = #tpu.pipeline_mode<synchronous>, transform_indices = @transform_0, window_bounds = array<i64: 8, 32>}, {pipeline_mode = #tpu.pipeline_mode<synchronous>, transform_indices = @transform_1, window_bounds = array<i64: 32, 256>}, {pipeline_mode = #tpu.pipeline_mode<synchronous>, transform_indices = @transform_2, window_bounds = array<i64: 1, 256>}, {pipeline_mode = #tpu.pipeline_mode<synchronous>, transform_indices = @transform_3, window_bounds = array<i64: 1, 256>}, {pipeline_mode = #tpu.pipeline_mode<synchronous>, transform_indices = @transform_4, window_bounds = array<i64: 1, 256>}, {pipeline_mode = #tpu.pipeline_mode<synchronous>, transform_indices = @transform_5, window_bounds = array<i64: 256, 256>}, {pipeline_mode = #tpu.pipeline_mode<synchronous>, transform_indices = @transform_6, window_bounds = array<i64: 1, 256>}, {pipeline_mode = #tpu.pipeline_mode<synchronous>, transform_indices = @transform_7, window_bounds = array<i64: 1, 256>}, {pipeline_mode = #tpu.pipeline_mode<synchronous>, transform_indices = @transform_8, window_bounds = array<i64: 1, 256>}, {transform_indices = @transform_9, window_bounds = array<i64: 256, 2432>}, {transform_indices = @transform_10, window_bounds = array<i64: 1, 2432>}, {transform_indices = @transform_11, window_bounds = array<i64: 8, 2432>}]} {
    %c0 = arith.constant 0 : index
    %c0_0 = arith.constant 0 : index
    %0 = vector.load %arg1[%c0, %c0_0] : memref<8x32xf32, #tpu.memory_space<vmem>>, vector<8x32xf32>
    %1 = arith.truncf %0 : vector<8x32xf32> to vector<8x32xbf16>
    %c0_1 = arith.constant 0 : index
    %c0_2 = arith.constant 0 : index
    %2 = vector.load %arg2[%c0_1, %c0_2] : memref<32x256xbf16, #tpu.memory_space<vmem>>, vector<32x256xbf16>
    %cst = arith.constant dense<0.000000e+00> : vector<8x256xf32>
    %3 = tpu.matmul %1, %2, %cst {dimension_numbers = #tpu.dot_dimension_numbers<[1], [0], [0], [1], [0, 0, 1, 1], [], []>} : vector<8x32xbf16>, vector<32x256xbf16>, vector<8x256xf32> -> vector<8x256xf32>
    %c0_3 = arith.constant 0 : index
    %c0_4 = arith.constant 0 : index
    %4 = vector.load %arg3[%c0_3, %c0_4] : memref<1x256xf32, #tpu.memory_space<vmem>>, vector<1x256xf32>
    %5 = vector.broadcast %4 : vector<1x256xf32> to vector<8x256xf32>
    %6 = arith.addf %3, %5 : vector<8x256xf32>
    %cst_5 = arith.constant dense<0.000000e+00> : vector<256xf32>
    %7 = vector.multi_reduction <add>, %6, %cst_5 [0] : vector<8x256xf32> to vector<256xf32>
    %8 = vector.shape_cast %7 : vector<256xf32> to vector<1x256xf32>
    %9 = arith.mulf %6, %6 : vector<8x256xf32>
    %cst_6 = arith.constant dense<0.000000e+00> : vector<256xf32>
    %10 = vector.multi_reduction <add>, %9, %cst_6 [0] : vector<8x256xf32> to vector<256xf32>
    %11 = vector.shape_cast %10 : vector<256xf32> to vector<1x256xf32>
    %cst_7 = arith.constant 1.250000e-01 : f32
    %12 = vector.broadcast %cst_7 : f32 to vector<1x256xf32>
    %13 = arith.mulf %8, %12 : vector<1x256xf32>
    %cst_8 = arith.constant 1.250000e-01 : f32
    %14 = vector.broadcast %cst_8 : f32 to vector<1x256xf32>
    %15 = arith.mulf %11, %14 : vector<1x256xf32>
    %16 = arith.mulf %13, %13 : vector<1x256xf32>
    %17 = arith.subf %15, %16 : vector<1x256xf32>
    %cst_9 = arith.constant 0.000000e+00 : f32
    %18 = vector.broadcast %cst_9 : f32 to vector<1x256xf32>
    %19 = arith.maximumf %17, %18 : vector<1x256xf32>
    %20 = vector.broadcast %13 : vector<1x256xf32> to vector<8x256xf32>
    %21 = arith.subf %6, %20 : vector<8x256xf32>
    %cst_10 = arith.constant 9.99999974E-6 : f32
    %22 = vector.broadcast %cst_10 : f32 to vector<1x256xf32>
    %23 = arith.addf %19, %22 : vector<1x256xf32>
    %24 = math.rsqrt %23 : vector<1x256xf32>
    %25 = vector.broadcast %24 : vector<1x256xf32> to vector<8x256xf32>
    %26 = arith.mulf %21, %25 : vector<8x256xf32>
    %c0_11 = arith.constant 0 : index
    %c0_12 = arith.constant 0 : index
    %27 = vector.load %arg4[%c0_11, %c0_12] : memref<1x256xf32, #tpu.memory_space<vmem>>, vector<1x256xf32>
    %28 = vector.broadcast %27 : vector<1x256xf32> to vector<8x256xf32>
    %29 = arith.mulf %26, %28 : vector<8x256xf32>
    %c0_13 = arith.constant 0 : index
    %c0_14 = arith.constant 0 : index
    %30 = vector.load %arg5[%c0_13, %c0_14] : memref<1x256xf32, #tpu.memory_space<vmem>>, vector<1x256xf32>
    %31 = vector.broadcast %30 : vector<1x256xf32> to vector<8x256xf32>
    %32 = arith.addf %29, %31 : vector<8x256xf32>
    %cst_15 = arith.constant 0.000000e+00 : f32
    %33 = vector.broadcast %cst_15 : f32 to vector<8x256xf32>
    %34 = arith.maximumf %32, %33 : vector<8x256xf32>
    %35 = arith.truncf %34 : vector<8x256xf32> to vector<8x256xbf16>
    %c0_16 = arith.constant 0 : index
    %c0_17 = arith.constant 0 : index
    %36 = vector.load %arg6[%c0_16, %c0_17] : memref<256x256xbf16, #tpu.memory_space<vmem>>, vector<256x256xbf16>
    %cst_18 = arith.constant dense<0.000000e+00> : vector<8x256xf32>
    %37 = tpu.matmul %35, %36, %cst_18 {dimension_numbers = #tpu.dot_dimension_numbers<[1], [0], [0], [1], [0, 0, 1, 1], [], []>} : vector<8x256xbf16>, vector<256x256xbf16>, vector<8x256xf32> -> vector<8x256xf32>
    %c0_19 = arith.constant 0 : index
    %c0_20 = arith.constant 0 : index
    %38 = vector.load %arg7[%c0_19, %c0_20] : memref<1x256xf32, #tpu.memory_space<vmem>>, vector<1x256xf32>
    %39 = vector.broadcast %38 : vector<1x256xf32> to vector<8x256xf32>
    %40 = arith.addf %37, %39 : vector<8x256xf32>
    %cst_21 = arith.constant dense<0.000000e+00> : vector<256xf32>
    %41 = vector.multi_reduction <add>, %40, %cst_21 [0] : vector<8x256xf32> to vector<256xf32>
    %42 = vector.shape_cast %41 : vector<256xf32> to vector<1x256xf32>
    %43 = arith.mulf %40, %40 : vector<8x256xf32>
    %cst_22 = arith.constant dense<0.000000e+00> : vector<256xf32>
    %44 = vector.multi_reduction <add>, %43, %cst_22 [0] : vector<8x256xf32> to vector<256xf32>
    %45 = vector.shape_cast %44 : vector<256xf32> to vector<1x256xf32>
    %cst_23 = arith.constant 1.250000e-01 : f32
    %46 = vector.broadcast %cst_23 : f32 to vector<1x256xf32>
    %47 = arith.mulf %42, %46 : vector<1x256xf32>
    %cst_24 = arith.constant 1.250000e-01 : f32
    %48 = vector.broadcast %cst_24 : f32 to vector<1x256xf32>
    %49 = arith.mulf %45, %48 : vector<1x256xf32>
    %50 = arith.mulf %47, %47 : vector<1x256xf32>
    %51 = arith.subf %49, %50 : vector<1x256xf32>
    %cst_25 = arith.constant 0.000000e+00 : f32
    %52 = vector.broadcast %cst_25 : f32 to vector<1x256xf32>
    %53 = arith.maximumf %51, %52 : vector<1x256xf32>
    %54 = vector.broadcast %47 : vector<1x256xf32> to vector<8x256xf32>
    %55 = arith.subf %40, %54 : vector<8x256xf32>
    %cst_26 = arith.constant 9.99999974E-6 : f32
    %56 = vector.broadcast %cst_26 : f32 to vector<1x256xf32>
    %57 = arith.addf %53, %56 : vector<1x256xf32>
    %58 = math.rsqrt %57 : vector<1x256xf32>
    %59 = vector.broadcast %58 : vector<1x256xf32> to vector<8x256xf32>
    %60 = arith.mulf %55, %59 : vector<8x256xf32>
    %c0_27 = arith.constant 0 : index
    %c0_28 = arith.constant 0 : index
    %61 = vector.load %arg8[%c0_27, %c0_28] : memref<1x256xf32, #tpu.memory_space<vmem>>, vector<1x256xf32>
    %62 = vector.broadcast %61 : vector<1x256xf32> to vector<8x256xf32>
    %63 = arith.mulf %60, %62 : vector<8x256xf32>
    %c0_29 = arith.constant 0 : index
    %c0_30 = arith.constant 0 : index
    %64 = vector.load %arg9[%c0_29, %c0_30] : memref<1x256xf32, #tpu.memory_space<vmem>>, vector<1x256xf32>
    %65 = vector.broadcast %64 : vector<1x256xf32> to vector<8x256xf32>
    %66 = arith.addf %63, %65 : vector<8x256xf32>
    %cst_31 = arith.constant 0.000000e+00 : f32
    %67 = vector.broadcast %cst_31 : f32 to vector<8x256xf32>
    %68 = arith.maximumf %66, %67 : vector<8x256xf32>
    %69 = arith.truncf %68 : vector<8x256xf32> to vector<8x256xbf16>
    %c0_32 = arith.constant 0 : index
    %c0_33 = arith.constant 0 : index
    %70 = vector.load %arg10[%c0_32, %c0_33] : memref<256x2432xbf16, #tpu.memory_space<vmem>>, vector<256x2432xbf16>
    %cst_34 = arith.constant dense<0.000000e+00> : vector<8x2432xf32>
    %71 = tpu.matmul %69, %70, %cst_34 {dimension_numbers = #tpu.dot_dimension_numbers<[1], [0], [0], [1], [0, 0, 1, 1], [], []>} : vector<8x256xbf16>, vector<256x2432xbf16>, vector<8x2432xf32> -> vector<8x2432xf32>
    %c0_35 = arith.constant 0 : index
    %c0_36 = arith.constant 0 : index
    %72 = vector.load %arg11[%c0_35, %c0_36] : memref<1x2432xf32, #tpu.memory_space<vmem>>, vector<1x2432xf32>
    %73 = vector.broadcast %72 : vector<1x2432xf32> to vector<8x2432xf32>
    %74 = arith.addf %71, %73 : vector<8x2432xf32>
    %c0_37 = arith.constant 0 : index
    %c0_38 = arith.constant 0 : index
    %75 = vector.load %arg12[%c0_37, %c0_38] : memref<8x2432xf32, #tpu.memory_space<vmem>>, vector<8x2432xf32>
    tpu.vector_store %arg12[%c0_37, %c0_38], %74 {strides = array<i32>} : memref<8x2432xf32, #tpu.memory_space<vmem>>, vector<8x2432xf32>,
    return
  }
  func.func @transform_0(%arg0: i32) -> (i32, i32) {
    %c0_i32 = arith.constant 0 : i32
    %c0_i32_0 = arith.constant 0 : i32
    %c0_i32_1 = arith.constant 0 : i32
    return %c0_i32, %c0_i32_0 : i32, i32
  }
  func.func @transform_1(%arg0: i32) -> (i32, i32) {
    %c0_i32 = arith.constant 0 : i32
    %c0_i32_0 = arith.constant 0 : i32
    %c0_i32_1 = arith.constant 0 : i32
    return %c0_i32, %c0_i32_0 : i32, i32
  }
  func.func @transform_2(%arg0: i32) -> (i32, i32) {
    %c0_i32 = arith.constant 0 : i32
    %c0_i32_0 = arith.constant 0 : i32
    %c0_i32_1 = arith.constant 0 : i32
    return %c0_i32, %c0_i32_0 : i32, i32
  }
  func.func @transform_3(%arg0: i32) -> (i32, i32) {
    %c0_i32 = arith.constant 0 : i32
    %c0_i32_0 = arith.constant 0 : i32
    %c0_i32_1 = arith.constant 0 : i32
    return %c0_i32, %c0_i32_0 : i32, i32
  }
  func.func @transform_4(%arg0: i32) -> (i32, i32) {
    %c0_i32 = arith.constant 0 : i32
    %c0_i32_0 = arith.constant 0 : i32
    %c0_i32_1 = arith.constant 0 : i32
    return %c0_i32, %c0_i32_0 : i32, i32
  }
  func.func @transform_5(%arg0: i32) -> (i32, i32) {
    %c0_i32 = arith.constant 0 : i32
    %c0_i32_0 = arith.constant 0 : i32
    %c0_i32_1 = arith.constant 0 : i32
    return %c0_i32, %c0_i32_0 : i32, i32
  }
  func.func @transform_6(%arg0: i32) -> (i32, i32) {
    %c0_i32 = arith.constant 0 : i32
    %c0_i32_0 = arith.constant 0 : i32
    %c0_i32_1 = arith.constant 0 : i32
    return %c0_i32, %c0_i32_0 : i32, i32
  }
  func.func @transform_7(%arg0: i32) -> (i32, i32) {
    %c0_i32 = arith.constant 0 : i32
    %c0_i32_0 = arith.constant 0 : i32
    %c0_i32_1 = arith.constant 0 : i32
    return %c0_i32, %c0_i32_0 : i32, i32
  }
  func.func @transform_8(%arg0: i32) -> (i32, i32) {
    %c0_i32 = arith.constant 0 : i32
    %c0_i32_0 = arith.constant 0 : i32
    %c0_i32_1 = arith.constant 0 : i32
    return %c0_i32, %c0_i32_0 : i32, i32
  }
  func.func @transform_9(%arg0: i32) -> (i32, i32) {
    %c0_i32 = arith.constant 0 : i32
    %c0_i32_0 = arith.constant 0 : i32
    return %c0_i32, %arg0 : i32, i32
  }
  func.func @transform_10(%arg0: i32) -> (i32, i32) {
    %c0_i32 = arith.constant 0 : i32
    %c0_i32_0 = arith.constant 0 : i32
    return %c0_i32, %arg0 : i32, i32
  }
  func.func @transform_11(%arg0: i32) -> (i32, i32) {
    %c0_i32 = arith.constant 0 : i32
    %c0_i32_0 = arith.constant 0 : i32
    return %c0_i32, %arg0 : i32, i32
  }
}

</mosaic_0001>

<bundles_post_ra>
// kernel: generator_w4_forward.1
= control target key start
LH: loop header
LB: loop body
LE: loop exit
PB: predicated region body
PF: predicated region fallthrough
CT: control target
= control target key end

     0   :  { %s5809_s0 = inlined_call_operand.vmem [shape: f32[8,32], index: 0, kind: input, shape index: {}]   ;;  %s5810_s1 = inlined_call_operand.hbm [shape: bf16[32,256], index: 1, kind: input, shape index: {}]   ;;  %s5811_s2 = inlined_call_operand.hbm [shape: f32[1,256], index: 2, kind: input, shape index: {}]   ;;  %s5812_s3 = inlined_call_operand.hbm [shape: f32[1,256], index: 3, kind: input, shape index: {}]   ;;  %s5813_s4 = inlined_call_operand.hbm [shape: f32[1,256], index: 4, kind: input, shape index: {}]   ;;  %s5814_s5 = inlined_call_operand.hbm [shape: bf16[256,256], index: 5, kind: input, shape index: {}]   ;;  %s5815_s6 = inlined_call_operand.hbm [shape: f32[1,256], index: 6, kind: input, shape index: {}]   ;;  %s5816_s7 = inlined_call_operand.hbm [shape: f32[1,256], index: 7, kind: input, shape index: {}]   ;;  %s5817_s8 = inlined_call_operand.hbm [shape: f32[1,256], index: 8, kind: input, shape index: {}]   ;;  %s5818_s9 = inlined_call_operand.hbm [shape: bf16[256,4864], index: 9, kind: input, shape index: {}]   ;;  %s5819_s10 = inlined_call_operand.hbm [shape: f32[1,4864], index: 10, kind: input, shape index: {}]   ;;  %s5820_s11 = inlined_call_operand.vmem [shape: f32[8,4864], index: 11, kind: output, shape index: {}]  }
   0x1   :  { %5833 = sst [smem:[#allocation24_spill]] %s5809_s0 }
   0x2   :  { %5834 = sst [smem:[#allocation25_spill]] %s5810_s1 }
   0x3   :  { %5835 = sst [smem:[#allocation26_spill]] %s5811_s2 }
   0x4   :  { %5836 = sst [smem:[#allocation27_spill]] %s5813_s4 }
   0x5   :  { %5837 = sst [smem:[#allocation28_spill]] %s5815_s6 }
   0x6   :  { %5838 = sst [smem:[#allocation29_spill]] %s5818_s9 }
   0x7   :  { %5839 = sst [smem:[#allocation30_spill]] %s5820_s11 }
   0x8   :  { %16 = vsyncpa [#allocation3], 0 }
   0x9   :  { %17 = vsyncpa [#allocation5], 0 }
   0xa   :  { %18 = vsyncpa [#allocation8], 0 }
   0xb   :  { %19 = vsyncpa [#allocation11], 0 }
   0xc   :  { %20 = vsyncpa [#allocation14], 0  ;;  %s5028_s17 = smov 0   ;;  %s5030_s18 = smov 0  }
   0xd   :  { %s5032_s19 = smov 0   ;;  %s5034_s20 = smov 0  }
   0xe LB: > { %s4952_s21 = smov [#allocation2]   ;;  %s5049_s23 = sadd.s32 4294967295, %s4950_s20   ;;  %s4950_s20 = sphi %s5034_s20, %s5877_s20   ;;  %s4946_s19 = sphi %s5032_s19, %s5876_s19   ;;  %s4942_s18 = sphi %s5030_s18, %s5875_s18   ;;  %s4938_s17 = sphi %s5028_s17, %s5874_s17  }
   0xf   : > { %s313_s22 = sshll.u32 %s4952_s21, 4  ;;  %p3578_p0 = scmp.ge.s32.totalorder %s4950_s20, 1  ;;  %s5054_s22 = int_to_ptr.vmem [resolvable:$true] %s313_s22 }
  0x10   : > { %p5822_p1 = scmp.eq.s32.totalorder %s5049_s23, 0  ;;  %p298_p2 = scmp.lt.s32.totalorder %s4950_s20, 3 }
  0x11   : > { %s4953_s25 = smov [#allocation4]   ;;  %s4954_s28 = smov [#allocation7]  }
  0x12   : > { %p5056_p3 = pnand %p3578_p0, %p298_p2  ;;  %s327_s26 = sshll.u32 %s4953_s25, 4  ;;  %s5068_s26 = int_to_ptr.vmem [resolvable:$true] %s327_s26 }
  0x13   : > { %s349_s29 = sshll.u32 %s4954_s28, 4  ;;  %s5843_s1 = sld [smem:[#allocation25_spill]]  ;;  %s5070_s29 = int_to_ptr.vmem [resolvable:$true] %s349_s29 }
  0x14   : > { %s5840_s24 = scalar_select %p5056_p3, 1, 0 }
  0x15   : > { %p4007_p4 = pneg %p5056_p3 }
  0x16   : > { %5841 = sst [smem:[#allocation23_spill]] %s5840_s24 }
  0x17   : > { %p5064_p5 = pnand %p4007_p4, %p5822_p1 }
  0x19   : > { %s5842_s27 = scalar_select %p5064_p5, 1, 0 }
  0x1a   : > { %s4612_s13 = scalar_lea.hbm %s5843_s1, 512  ;;  %p5080_p7 = pneg %p5064_p5 }
  0x1b   : > { %p4613_p6 = scmp.ne.s32.totalorder %s5843_s1, %s4612_s13  ;;  %p4619_p10 = scmp.lt.u32.totalorder %s4612_s13, %s5843_s1 }
  0x1d   : > { %p4615_p8 = pnand %p5080_p7, %p4613_p6 }
  0x1f   : > { %p4616_p9 = pneg %p4615_p8 }
  0x21   : > { %p4621_p11 = pnand %p4619_p10, %p4616_p9 }
  0x23   : > { %4624 = shalt.err (!%p4621_p11)
}
  0x24   : > { %s4625_s28 = scalar_lea.vmem %s5054_s22, 512  ;;  %p4633_p2 = scmp.lt.s32.totalorder %s5054_s22, %s5054_s22 }
  0x25   : > { %p4626_p12 = scmp.ne.s32.totalorder %s5054_s22, %s4625_s28  ;;  %p4634_p4 = scmp.lt.s32.totalorder %s4625_s28, %s4625_s28 }
  0x27   : > { %p4628_p13 = pnand %p4626_p12, %p5080_p7  ;;  %p4635_p6 = por %p4634_p4, %p4633_p2 }
  0x29   : > { %p4629_p0 = pneg %p4628_p13 }
  0x2b   : > { %p4636_p8 = pnand %p4635_p6, %p4629_p0 }
  0x2d   : > { %4639 = shalt.err (!%p4636_p8)
}
  0x2e   : > { %s5825_s30 = smov 128   ;;  %s5826_s12 = smov 8  }
  0x2f   : > { %4010 = dma.hbm_to_vmem [thread:$0]  (!%p5064_p5), %s5843_s1, 512, %s5054_s22, [#allocation3], %s5825_s30, %s5825_s30, %s5826_s12  }
  0x30   : > { %s5845_s2 = sld [smem:[#allocation26_spill]] }
  0x36   : > { %s4640_s25 = scalar_lea.hbm %s5845_s2, 32 }
  0x37   : > { %p4641_p9 = scmp.ne.s32.totalorder %s5845_s2, %s4640_s25  ;;  %p4647_p12 = scmp.lt.u32.totalorder %s4640_s25, %s5845_s2 }
  0x39   : > { %p4643_p10 = pnand %p4641_p9, %p5080_p7 }
  0x3b   : > { %p4644_p11 = pneg %p4643_p10 }
  0x3d   : > { %p4649_p13 = pnand %p4647_p12, %p4644_p11 }
  0x3f   : > { %4652 = shalt.err (!%p4649_p13)
}
  0x40   : > { %s4653_s22 = scalar_lea.vmem %s5068_s26, 32  ;;  %p4661_p6 = scmp.lt.s32.totalorder %s5068_s26, %s5068_s26 }
  0x41   : > { %p4654_p0 = scmp.ne.s32.totalorder %s5068_s26, %s4653_s22  ;;  %p4662_p8 = scmp.lt.s32.totalorder %s4653_s22, %s4653_s22 }
  0x43   : > { %p4656_p2 = pnand %p4654_p0, %p5080_p7  ;;  %p4663_p9 = por %p4662_p8, %p4661_p6 }
  0x45   : > { %p4657_p4 = pneg %p4656_p2 }
  0x47   : > { %p4664_p10 = pnand %p4663_p9, %p4657_p4 }
  0x49   : > { %4667 = shalt.err (!%p4664_p10)
}
  0x4a   : > { %4013 = dma.hbm_to_vmem [thread:$0]  (!%p5064_p5), %s5845_s2, 32, %s5068_s26, [#allocation5]  }
  0x4b   : > { %s5846_s4 = sld [smem:[#allocation27_spill]] }
  0x51   : > { %s4668_s14 = scalar_lea.hbm %s5846_s4, 32 }
  0x52   : > { %p4669_p11 = scmp.ne.s32.totalorder %s5846_s4, %s4668_s14  ;;  %p4675_p0 = scmp.lt.u32.totalorder %s4668_s14, %s5846_s4 }
  0x54   : > { %p4671_p12 = pnand %p4669_p11, %p5080_p7 }
  0x56   : > { %p4672_p13 = pneg %p4671_p12 }
  0x58   : > { %p4677_p2 = pnand %p4675_p0, %p4672_p13 }
  0x5a   : > { %4680 = shalt.err (!%p4677_p2)
}
  0x5b   : > { %s4681_s26 = scalar_lea.vmem %s5070_s29, 32  ;;  %p4689_p9 = scmp.lt.s32.totalorder %s5070_s29, %s5070_s29 }
  0x5c   : > { %p4682_p4 = scmp.ne.s32.totalorder %s5070_s29, %s4681_s26  ;;  %p4690_p10 = scmp.lt.s32.totalorder %s4681_s26, %s4681_s26 }
  0x5e   : > { %p4684_p6 = pnand %p4682_p4, %p5080_p7  ;;  %p4691_p11 = por %p4690_p10, %p4689_p9 }
  0x60   : > { %p4685_p8 = pneg %p4684_p6 }
  0x62   : > { %p4692_p12 = pnand %p4691_p11, %p4685_p8 }
  0x64   : > { %4695 = shalt.err (!%p4692_p12)
}
  0x65   : > { %4019 = dma.hbm_to_vmem [thread:$0]  (!%p5064_p5), %s5846_s4, 32, %s5070_s29, [#allocation8]  }
  0x66   : > { %s4957_s11 = smov [#allocation10]   ;;  %s5847_s6 = sld [smem:[#allocation28_spill]] }
  0x67   : > { %s373_s24 = sshll.u32 %s4957_s11, 4  ;;  %s374_s24 = int_to_ptr.vmem [resolvable:$true] %s373_s24 }
  0x6c   : > { %s4696_s15 = scalar_lea.hbm %s5847_s6, 32 }
  0x6d   : > { %p4697_p13 = scmp.ne.s32.totalorder %s5847_s6, %s4696_s15  ;;  %p4703_p4 = scmp.lt.u32.totalorder %s4696_s15, %s5847_s6 }
  0x6f   : > { %p4699_p0 = pnand %p4697_p13, %p5080_p7 }
  0x71   : > { %p4700_p2 = pneg %p4699_p0 }
  0x73   : > { %p4705_p6 = pnand %p4703_p4, %p4700_p2 }
  0x75   : > { %4708 = shalt.err (!%p4705_p6)
}
  0x76   : > { %s4709_s29 = scalar_lea.vmem %s374_s24, 32  ;;  %p4717_p11 = scmp.lt.s32.totalorder %s374_s24, %s374_s24 }
  0x77   : > { %p4710_p8 = scmp.ne.s32.totalorder %s374_s24, %s4709_s29  ;;  %p4718_p12 = scmp.lt.s32.totalorder %s4709_s29, %s4709_s29 }
  0x79   : > { %p4712_p9 = pnand %p4710_p8, %p5080_p7  ;;  %p4719_p1 = por %p4718_p12, %p4717_p11 }
  0x7b   : > { %p4713_p10 = pneg %p4712_p9 }
  0x7d   : > { %p4720_p3 = pnand %p4719_p1, %p4713_p10 }
  0x7f   : > { %4723 = shalt.err (!%p4720_p3)
}
  0x80   : > { %4025 = dma.hbm_to_vmem [thread:$0]  (!%p5064_p5), %s5847_s6, 32, %s374_s24, [#allocation11]  }
  0x81   : > { %s5169_s11 = sadd.s32 1, %s4950_s20   ;;  %s222_s13 = sadd.s32 1, %s4946_s19 }
  0x82   : > { %s219_s14 = ssub.s32 %s4950_s20, %s5169_s11  ;;  %p229_p1 = scmp.ne.s32.totalorder %s4946_s19, %s4942_s18 }
  0x83   : > { %p220_p3 = scmp.eq.s32.totalorder %s219_s14, 0  ;;  %p230_p13 = scmp.eq.s32.totalorder %s4950_s20, 0 }
  0x84   : > { %p235_p0 = scmp.ne.s32.totalorder %s4942_s18, %s4938_s17  ;;  %p4047_p2 = scmp.lt.s32.totalorder %s4950_s20, 2 }
  0x85   : > { %s5181_s15 = scalar_select %p220_p3, %s4946_s19, %s222_s13  }
  0x86   : > { %p231_p4 = por %p230_p13, %p229_p1  ;;  %p5848_p6 = scmp.eq.s32.totalorder %s5049_s23, 0 }
  0x87   : > { %s406_s25 = sand.u32 1, %s4950_s20   ;;  %s5824_s24 = sand.u32 1, %s4946_s19  }
  0x88   : > { %p5185_p8 = por %p5848_p6, %p235_p0  ;;  %s3967_s28 = smul.u32 2432, %s5824_s24 }
  0x89   : > { %s3943_s26 = smul.u32 1216, %s4950_s20  ;;  %p5194_p9 = pnand %p4047_p2, %p231_p4 }
  0x8a   : > { %s5849_s21 = scalar_select %p5185_p8, 1, 0 }
  0x8b   : > { %s5850_s29 = scalar_select %p5194_p9, 1, 0 }
  0x8c   : > { %s5851_s9 = sld [smem:[#allocation29_spill]]  ;;  %s410_s13 = scalar_lea.vmem [#allocation15], %s3967_s28 }
  0x8d   : > { %s417_s14 = sshll.u32 %s410_s13, 4  ;;  %s5205_s24 = scalar_lea.sflag [#allocation3], %s406_s25  ;;  %s5203_s14 = int_to_ptr.vmem [resolvable:$true] %s417_s14 }
  0x8e   : > { %p5830_p11 = pneg %p5194_p9 }
  0x92   : > { %s5201_s0 = scalar_lea.hbm %s5851_s9, %s3943_s26  ;;  %s4729_s17 = scalar_lea.hbm %s5851_s9, 77824 }
  0x93   : > { %s4724_s30 = scalar_lea.hbm %s5201_s0, 38912  ;;  %p4730_p3 = scmp.lt.u32.totalorder %s5201_s0, %s5851_s9 }
  0x94   : > { %p4725_p10 = scmp.ne.s32.totalorder %s5201_s0, %s4724_s30  ;;  %p4731_p13 = scmp.lt.u32.totalorder %s4729_s17, %s4724_s30 }
  0x95   : > { %p4733_p2 = scmp.lt.u32.totalorder %s4724_s30, %s5201_s0 }
  0x96   : > { %p4727_p12 = pnand %p5830_p11, %p4725_p10  ;;  %p4732_p0 = por %p4731_p13, %p4730_p3 }
  0x98   : > { %p4728_p1 = pneg %p4727_p12  ;;  %p4734_p4 = por %p4733_p2, %p4732_p0 }
  0x9a   : > { %p4735_p6 = pnand %p4734_p4, %p4728_p1 }
  0x9c   : > { %4738 = shalt.err (!%p4735_p6)
}
  0x9d   : > { %s4739_s25 = scalar_lea.vmem %s5203_s14, 38912  ;;  %s4958_s28 = smov [#allocation15]  }
  0x9e   : > { %p4740_p10 = scmp.ne.s32.totalorder %s5203_s14, %s4739_s25  ;;  %s4744_s13 = sshll.u32 %s4958_s28, 4  ;;  %s4745_s13 = int_to_ptr.vmem [resolvable:$false] %s4744_s13 }
  0x9f   : > { %s4746_s1 = scalar_lea.vmem %s4745_s13, 77824  ;;  %p4747_p5 = scmp.lt.s32.totalorder %s5203_s14, %s4745_s13 }
  0xa0   : > { %p4742_p12 = pnand %p4740_p10, %p5830_p11  ;;  %p4748_p3 = scmp.lt.s32.totalorder %s4746_s1, %s4739_s25 }
  0xa2   : > { %p4743_p8 = pneg %p4742_p12  ;;  %p4749_p13 = por %p4748_p3, %p4747_p5 }
  0xa4   : > { %p4750_p0 = pnand %p4749_p13, %p4743_p8 }
  0xa6   : > { %4753 = shalt.err (!%p4750_p0)
}
  0xa7   : > { %s4959_s30 = smov 2432   ;;  %s4960_s12 = smov 1216  }
  0xa8   : > { %s4961_s26 = smov 76   ;;  %s4962_s22 = smov [#allocation6]  }
  0xa9   : > { %4035 = dma.hbm_to_vmem [thread:$0]  (!%p5194_p9), %s5201_s0, 38912, %s5203_s14, %s5205_s24, %s4959_s30, %s4960_s12, %s4961_s26  }
  0xaa   : > { %s338_s17 = sshll.u32 %s4962_s22, 4  ;;  %s4963_s28 = smov [#allocation9]   ;;  %s339_s17 = int_to_ptr.vmem [resolvable:$true] %s338_s17 }
  0xab   : > { %s359_s2 = sshll.u32 %s4963_s28, 4  ;;  %s4754_s1 = scalar_lea.hbm %s5812_s3, 32  ;;  %s5233_s2 = int_to_ptr.vmem [resolvable:$true] %s359_s2 }
  0xac   : > { %p4755_p5 = scmp.ne.s32.totalorder %s5812_s3, %s4754_s1  ;;  %p4761_p2 = scmp.lt.u32.totalorder %s4754_s1, %s5812_s3 }
  0xae   : > { %p4757_p8 = pnand %p4755_p5, %p5080_p7 }
  0xb0   : > { %p4758_p1 = pneg %p4757_p8 }
  0xb2   : > { %p4763_p4 = pnand %p4761_p2, %p4758_p1 }
  0xb4   : > { %4766 = shalt.err (!%p4763_p4)
}
  0xb5   : > { %s4767_s14 = scalar_lea.vmem %s339_s17, 32  ;;  %p4775_p3 = scmp.lt.s32.totalorder %s339_s17, %s339_s17 }
  0xb6   : > { %p4768_p6 = scmp.ne.s32.totalorder %s339_s17, %s4767_s14  ;;  %p4776_p13 = scmp.lt.s32.totalorder %s4767_s14, %s4767_s14 }
  0xb8   : > { %p4770_p10 = pnand %p4768_p6, %p5080_p7  ;;  %p4777_p0 = por %p4776_p13, %p4775_p3 }
  0xba   : > { %p4771_p12 = pneg %p4770_p10 }
  0xbc   : > { %p4778_p11 = pnand %p4777_p0, %p4771_p12 }
  0xbe   : > { %4781 = shalt.err (!%p4778_p11)
}
  0xbf   : > { %p5852_p5 = scmp.ne.s32.totalorder %s5842_s27, 0  ;;  %s4782_s12 = scalar_lea.hbm %s5814_s5, 4096 }
  0xc0   : > { %p4783_p8 = scmp.ne.s32.totalorder %s5814_s5, %s4782_s12  ;;  %p4789_p11 = scmp.lt.u32.totalorder %s4782_s12, %s5814_s5 }
  0xc1   : > { %4016 = dma.hbm_to_vmem [thread:$0]  (!%p5852_p5), %s5812_s3, 32, %s339_s17, [#allocation5]  }
  0xc2   : > { %p4785_p1 = pnand %p4783_p8, %p5080_p7 }
  0xc4   : > { %p4786_p2 = pneg %p4785_p1 }
  0xc6   : > { %p4791_p4 = pnand %p4789_p11, %p4786_p2 }
  0xc8   : > { %4794 = shalt.err (!%p4791_p4)
}
  0xc9   : > { %s4795_s17 = scalar_lea.vmem %s5233_s2, 4096  ;;  %p4803_p3 = scmp.lt.s32.totalorder %s5233_s2, %s5233_s2 }
  0xca   : > { %p4796_p6 = scmp.ne.s32.totalorder %s5233_s2, %s4795_s17  ;;  %p4804_p13 = scmp.lt.s32.totalorder %s4795_s17, %s4795_s17 }
  0xcc   : > { %p4798_p10 = pnand %p4796_p6, %p5080_p7  ;;  %p4805_p0 = por %p4804_p13, %p4803_p3 }
  0xce   : > { %p4799_p12 = pneg %p4798_p10 }
  0xd0   : > { %p4806_p8 = pnand %p4805_p0, %p4799_p12 }
  0xd2   : > { %4809 = shalt.err (!%p4806_p8)
}
  0xd3   : > { %s5853_s13 = smov 8   ;;  %s5854_s1 = smov 128  }
  0xd4   : > { %4022 = dma.hbm_to_vmem [thread:$0]  (!%p5852_p5), %s5814_s5, 4096, %s5233_s2, [#allocation8], %s5854_s1, %s5854_s1, %s5853_s13  }
  0xd5   : > { %s4964_s4 = smov [#allocation12]   ;;  %s4965_s9 = smov [#allocation13]  }
  0xd6   : > { %s384_s6 = sshll.u32 %s4964_s4, 4  ;;  %s395_s30 = sshll.u32 %s4965_s9, 4  ;;  %s385_s6 = int_to_ptr.vmem [resolvable:$true] %s384_s6  ;;  %s5279_s30 = int_to_ptr.vmem [resolvable:$true] %s395_s30 }
  0xd7   : > { %s4810_s22 = scalar_lea.hbm %s5816_s7, 32 }
  0xd8   : > { %p4811_p1 = scmp.ne.s32.totalorder %s5816_s7, %s4810_s22  ;;  %p4817_p4 = scmp.lt.u32.totalorder %s4810_s22, %s5816_s7 }
  0xda   : > { %p4813_p2 = pnand %p4811_p1, %p5080_p7 }
  0xdc   : > { %p4814_p11 = pneg %p4813_p2 }
  0xde   : > { %p4819_p6 = pnand %p4817_p4, %p4814_p11 }
  0xe0   : > { %4822 = shalt.err (!%p4819_p6)
}
  0xe1   : > { %s4823_s13 = scalar_lea.vmem %s385_s6, 32  ;;  %p4831_p13 = scmp.lt.s32.totalorder %s385_s6, %s385_s6 }
  0xe2   : > { %p4824_p10 = scmp.ne.s32.totalorder %s385_s6, %s4823_s13  ;;  %p4832_p0 = scmp.lt.s32.totalorder %s4823_s13, %s4823_s13 }
  0xe4   : > { %p4826_p12 = pnand %p4824_p10, %p5080_p7  ;;  %p4833_p8 = por %p4832_p0, %p4831_p13 }
  0xe6   : > { %p4827_p3 = pneg %p4826_p12 }
  0xe8   : > { %p4834_p9 = pnand %p4833_p8, %p4827_p3 }
  0xea   : > { %4837 = shalt.err (!%p4834_p9)
}
  0xeb   : > { %4028 = dma.hbm_to_vmem [thread:$0]  (!%p5852_p5), %s5816_s7, 32, %s385_s6, [#allocation11]  }
  0xec   : > { %s4838_s9 = scalar_lea.hbm %s5817_s8, 32 }
  0xed   : > { %p4839_p1 = scmp.ne.s32.totalorder %s5817_s8, %s4838_s9  ;;  %p4845_p9 = scmp.lt.u32.totalorder %s4838_s9, %s5817_s8 }
  0xef   : > { %p4841_p2 = pnand %p4839_p1, %p5080_p7 }
  0xf1   : > { %p4842_p11 = pneg %p4841_p2 }
  0xf3   : > { %p4847_p4 = pnand %p4845_p9, %p4842_p11 }
  0xf5   : > { %4850 = shalt.err (!%p4847_p4)
}
  0xf6   : > { %s4851_s6 = scalar_lea.vmem %s5279_s30, 32  ;;  %p4859_p3 = scmp.lt.s32.totalorder %s5279_s30, %s5279_s30 }
  0xf7   : > { %p4852_p6 = scmp.ne.s32.totalorder %s5279_s30, %s4851_s6  ;;  %p4860_p13 = scmp.lt.s32.totalorder %s4851_s6, %s4851_s6 }
  0xf9   : > { %p4854_p10 = pnand %p4852_p6, %p5080_p7  ;;  %p4861_p0 = por %p4860_p13, %p4859_p3 }
  0xfb   : > { %p4855_p12 = pneg %p4854_p10 }
  0xfd   : > { %p4862_p8 = pnand %p4861_p0, %p4855_p12 }
  0xff   : > { %4865 = shalt.err (!%p4862_p8)
}
 0x100   : > { %4031 = dma.hbm_to_vmem [thread:$0]  (!%p5852_p5), %s5817_s8, 32, %s5279_s30, [#allocation14]  }
 0x101   : > { %s5855_s2 = sand.u32 1, %s4946_s19   ;;  %s3944_s13 = smul.u32 304, %s4950_s20 }
 0x102   : > { %s3968_s16 = smul.u32 19, %s5855_s2  ;;  %p5856_p1 = scmp.ne.s32.totalorder %s5850_s29, 0 }
 0x103   : > { %s5328_s14 = scalar_lea.hbm %s5819_s10, %s3944_s13  ;;  %s4871_s12 = scalar_lea.hbm %s5819_s10, 608 }
 0x104   : > { %s431_s27 = scalar_lea.vmem [#allocation16], %s3968_s16  ;;  %s4866_s9 = scalar_lea.hbm %s5328_s14, 304 }
 0x105   : > { %s439_s4 = sshll.u32 %s431_s27, 4  ;;  %p4867_p7 = scmp.ne.s32.totalorder %s5328_s14, %s4866_s9  ;;  %s440_s4 = int_to_ptr.vmem [resolvable:$true] %s439_s4 }
 0x106   : > { %p5857_p2 = pneg %p5856_p1  ;;  %p4872_p9 = scmp.lt.u32.totalorder %s5328_s14, %s5819_s10 }
 0x107   : > { %p4873_p4 = scmp.lt.u32.totalorder %s4871_s12, %s4866_s9  ;;  %p4875_p10 = scmp.lt.u32.totalorder %s4866_s9, %s5328_s14 }
 0x108   : > { %p4869_p5 = pnand %p4867_p7, %p5857_p2 }
 0x109   : > { %p4874_p6 = por %p4873_p4, %p4872_p9 }
 0x10a   : > { %p4870_p11 = pneg %p4869_p5 }
 0x10b   : > { %p4876_p12 = por %p4875_p10, %p4874_p6 }
 0x10d   : > { %p4877_p3 = pnand %p4876_p12, %p4870_p11 }
 0x10f   : > { %4880 = shalt.err (!%p4877_p3)
}
 0x110   : > { %s4881_s28 = scalar_lea.vmem %s440_s4, 304  ;;  %p5858_p0 = pmov %p5857_p2 }
 0x111   : > { %p4882_p13 = scmp.ne.s32.totalorder %s440_s4, %s4881_s28  ;;  %s4966_s6 = smov [#allocation16]  }
 0x112   : > { %s4886_s25 = sshll.u32 %s4966_s6, 4  ;;  %s4887_s25 = int_to_ptr.vmem [resolvable:$false] %s4886_s25 }
 0x113   : > { %p4884_p8 = pnand %p4882_p13, %p5858_p0  ;;  %s4888_s17 = scalar_lea.vmem %s4887_s25, 608 }
 0x114   : > { %p4889_p2 = scmp.lt.s32.totalorder %s440_s4, %s4887_s25  ;;  %p4890_p5 = scmp.lt.s32.totalorder %s4888_s17, %s4881_s28 }
 0x115   : > { %p4885_p7 = pneg %p4884_p8 }
 0x116   : > { %p4891_p4 = por %p4890_p5, %p4889_p2 }
 0x118   : > { %p4892_p9 = pnand %p4891_p4, %p4885_p7 }
 0x11a   : > { %4895 = shalt.err (!%p4892_p9)
}
 0x11b   : > { %4038 = dma.hbm_to_vmem [thread:$0]  (!%p5856_p1), %s5328_s14, 304, %s440_s4, %s5205_s24  }
 0x11c   : > { %s5859_s2 = sld [smem:[#allocation23_spill]] }
 0x122   : > { %p5860_p11 = scmp.ne.s32.totalorder %s5859_s2, 0 }
 0x123   : > { %p5861_p6 = scmp.eq.s32.totalorder (!%p5860_p11), %s5049_s23, 0 }
 0x124   : > { %448 = sbr.rel (%p5860_p11) target bundleno = 1318 (0x526), region = 64 }
 0x12b   : > { %4913 = dma.done.wait (%p5861_p6), [#allocation3], 512   ;;  %p5862_p10 = pmov %p5861_p6 }
 0x12c   : > { %p5863_p12 = pmov %p5861_p6 }
 0x12d   : > { %4915 = vsyncadd (%p5862_p10), [#allocation3], 4294966784 }
 0x12e   : > { %4917 = dma.done.wait (%p5863_p12), [#allocation5], 64   ;;  %p5864_p3 = pmov %p5861_p6 }
 0x130   : > { %4919 = vsyncadd (%p5864_p3), [#allocation5], 4294967232  ;;  %p5865_p13 = pmov %p5864_p3 }
 0x131   : > { %p5866_p1 = pmov %p5864_p3 }
 0x132   : > { %4921 = dma.done.wait (%p5865_p13), [#allocation8], 4128  }
 0x133   : > { %4923 = vsyncadd (%p5866_p1), [#allocation8], 4294963168  ;;  %p5867_p0 = pmov %p5866_p1 }
 0x135   : > { %4925 = dma.done.wait (%p5867_p0), [#allocation11], 64   ;;  %p5868_p8 = pmov %p5867_p0 }
 0x136   : > { %p5869_p7 = pmov %p5867_p0 }
 0x137   : > { %4927 = vsyncadd (%p5868_p8), [#allocation11], 4294967232 }
 0x138   : > { %4929 = dma.done.wait (%p5869_p7), [#allocation14], 32   ;;  %p5870_p2 = pmov %p5867_p0 }
 0x139   : > { %s482_s24 = sand.u32 1, %s5049_s23   ;;  %s484_s29 = sand.u32 1, %s4942_s18  }
 0x13a   : > { %4931 = vsyncadd (%p5870_p2), [#allocation14], 4294967264  ;;  %s3969_s16 = smul.u32 2432, %s484_s29  ;;  %s483_s13 = scalar_lea.sflag [#allocation3], %s482_s24 }
 0x13b   : > { %p5871_p5 = scmp.ne.s32.totalorder %s5849_s21, 0 }
 0x13c   : > { %s5376_s1 = scalar_lea.vmem [#allocation15], %s3969_s16 }
 0x13d   : > { %4933 = dma.done.wait (%p5871_p5), %s483_s13, 39216  }
 0x13e   : > { %4935 = vsyncadd (%p5871_p5), %s483_s13, 4294928080  ;;  %v4967_v0 = vmov 0   ;;  %v4102_v1 = vld [vmem:[#allocation2 + $0x4] ss:$8 sps:$4 sm:$0xff]   ;;  %v4104_v2 = vld [vmem:[#allocation2] ss:$8 sps:$4 sm:$0xff]   ;;  %v556_v50 = vlaneseq }
 0x13f   : > { %622 = vmatprep.mubr.bf16.mxu0 %v4967_v0  ;;  %590 = vmatprep.subr.bf16.mxu0 %v4102_v1  ;;  %v4105_v3 = vld [vmem:[#allocation2 + $0x14] ss:$8 sps:$4 sm:$0xff]   ;;  %v4107_v4 = vld [vmem:[#allocation2 + $0x10] ss:$8 sps:$4 sm:$0xff]   ;;  %s5872_s27 = sld [smem:[#allocation24_spill]]  ;;  %vm586_vm0 = vcmask 261120  }
 0x140   : > { %591 = vmatpush1.bf16.msra.mxu0 %v4104_v2  ;;  %v4108_v6 = vld [vmem:[#allocation9 + $0x4] ss:$8 sps:$4 sm:$0xff]   ;;  %v4110_v7 = vld [vmem:[#allocation9] ss:$8 sps:$4 sm:$0xff]   ;;  %v4111_v8 = vld [vmem:[#allocation9 + $0x14] ss:$8 sps:$4 sm:$0xff]  }
 0x141   : > { %592 = vmatprep.subr.bf16.mxu0 %v4105_v3  ;;  %911 = vmatprep.subr.bf16.mxu1 %v4108_v6  ;;  %v4113_v10 = vld [vmem:[#allocation9 + $0x10] ss:$8 sps:$4 sm:$0xff]   ;;  %v4114_v11 = vld [vmem:[#allocation9 + $0x24] ss:$8 sps:$4 sm:$0xff]   ;;  %v4116_v12 = vld [vmem:[#allocation9 + $0x20] ss:$8 sps:$4 sm:$0xff]  }
 0x142   : > { %912 = vmatpush1.bf16.msra.mxu1 %v4110_v7  ;;  %v4117_v13 = vld [vmem:[#allocation9 + $0x34] ss:$8 sps:$4 sm:$0xff]   ;;  %v4119_v14 = vld [vmem:[#allocation9 + $0x30] ss:$8 sps:$4 sm:$0xff]   ;;  %v4120_v15 = vld [vmem:[#allocation9 + $0x44] ss:$8 sps:$4 sm:$0xff]  }
 0x143   : > { %913 = vmatprep.subr.bf16.mxu1 %v4111_v8  ;;  %v4122_v16 = vld [vmem:[#allocation9 + $0x40] ss:$8 sps:$4 sm:$0xff]   ;;  %v4123_v17 = vld [vmem:[#allocation9 + $0x54] ss:$8 sps:$4 sm:$0xff]   ;;  %v4125_v18 = vld [vmem:[#allocation9 + $0x50] ss:$8 sps:$4 sm:$0xff]  }
 0x144   : > { %593 = vmatpush1.bf16.msra.mxu0 %v4107_v4  ;;  %v4126_v19 = vld [vmem:[#allocation9 + $0x64] ss:$8 sps:$4 sm:$0xff]   ;;  %v4128_v20 = vld [vmem:[#allocation9 + $0x60] ss:$8 sps:$4 sm:$0xff]   ;;  %v4129_v21 = vld [vmem:[#allocation9 + $0x74] ss:$8 sps:$4 sm:$0xff]  }
 0x145   : > { %v548_v5 = vld [vmem:[%s5872_s27] sm:$0xff]  ;;  %v4132_v23 = vld [vmem:[#allocation9 + $0x84] ss:$8 sps:$4 sm:$0xff]   ;;  %v5396_v51 = vshrl.u32 %v556_v50, 7  ;;  %s541_s21 = smul.u32 19, %s5049_s23  ;;  %s5873_s12 = sld [smem:[#allocation30_spill]] }
 0x146   : > { %v549_v9 = vpack.c.bf16 %v548_v5, %v548_v5  ;;  %914 = vmatpush1.bf16.msra.mxu1 %v4113_v10  ;;  %v4131_v22 = vld [vmem:[#allocation9 + $0x70] ss:$8 sps:$4 sm:$0xff]   ;;  %v4134_v24 = vld [vmem:[#allocation9 + $0x80] ss:$8 sps:$4 sm:$0xff]   ;;  %v4135_v25 = vld [vmem:[#allocation9 + $0x94] ss:$8 sps:$4 sm:$0xff]  }
 0x147   : > { %915 = vmatprep.subr.bf16.mxu1 %v4114_v11  ;;  %v4137_v26 = vld [vmem:[#allocation9 + $0x90] ss:$8 sps:$4 sm:$0xff]   ;;  %v4138_v27 = vld [vmem:[#allocation9 + $0xa4] ss:$8 sps:$4 sm:$0xff]   ;;  %v4140_v28 = vld [vmem:[#allocation9 + $0xa0] ss:$8 sps:$4 sm:$0xff]  }
 0x148   : > { %3604 = vmatmul.mubr.msk.bf16.vlgmr.msra.gmra.mrb[0].mxu0 %vm586_vm0, %v549_v9  ;;  %v4141_v29 = vld [vmem:[#allocation9 + $0xb4] ss:$8 sps:$4 sm:$0xff]   ;;  %v4143_v30 = vld [vmem:[#allocation9 + $0xb0] ss:$8 sps:$4 sm:$0xff]   ;;  %v4144_v31 = vld [vmem:[#allocation9 + $0xc4] ss:$8 sps:$4 sm:$0xff]  }
 0x149   : > { %v4146_v32 = vld [vmem:[#allocation9 + $0xc0] ss:$8 sps:$4 sm:$0xff]   ;;  %v4147_v33 = vld [vmem:[#allocation9 + $0xd4] ss:$8 sps:$4 sm:$0xff]   ;;  %v4149_v34 = vld [vmem:[#allocation9 + $0xd0] ss:$8 sps:$4 sm:$0xff]  }
 0x14a   : > { %916 = vmatpush1.bf16.msra.mxu1 %v4116_v12  ;;  %v4150_v35 = vld [vmem:[#allocation9 + $0xe4] ss:$8 sps:$4 sm:$0xff]   ;;  %v4152_v36 = vld [vmem:[#allocation9 + $0xe0] ss:$8 sps:$4 sm:$0xff]   ;;  %v4153_v37 = vld [vmem:[#allocation9 + $0xf4] ss:$8 sps:$4 sm:$0xff]  }
 0x14b   : > { %917 = vmatprep.subr.bf16.mxu1 %v4117_v13  ;;  %v4155_v38 = vld [vmem:[#allocation9 + $0xf0] ss:$8 sps:$4 sm:$0xff]   ;;  %v4162_v43 = vld [vmem:[%s5376_s1 + $0x98] ss:$76 sps:$4 sm:$0xff]   ;;  %v5399_v52 = vsub.s32 0, %v5396_v51  ;;  %v5402_v54 = vsub.s32 1, %v5396_v51 }
 0x14c   : > { %v4156_v39 = vld [vmem:[%s5376_s1] ss:$76 sps:$4 sm:$0xff]   ;;  %v4158_v40 = vld [vmem:[%s5376_s1 + $0x4] ss:$76 sps:$4 sm:$0xff]   ;;  %v4164_v42 = vld [vmem:[%s5376_s1 + $0x9c] ss:$76 sps:$4 sm:$0xff]  }
 0x14d   : > { %v4161_v41 = vld [vmem:[%s5376_s1 + $0xc] ss:$76 sps:$4 sm:$0xff]   ;;  %2985 = vmatprep.subr.bf16.mxu0 %v4158_v40  ;;  %v4170_v44 = vld [vmem:[%s5376_s1 + $0x134] ss:$76 sps:$4 sm:$0xff]   ;;  %v4168_v45 = vld [vmem:[%s5376_s1 + $0x130] ss:$76 sps:$4 sm:$0xff]  }
 0x14e   : > { %918 = vmatpush1.bf16.msra.mxu1 %v4119_v14  ;;  %2986 = vmatpush1.bf16.msra.mxu0 %v4156_v39  ;;  %v4176_v46 = vld [vmem:[%s5376_s1 + $0x1cc] ss:$76 sps:$4 sm:$0xff]   ;;  %v4174_v47 = vld [vmem:[%s5376_s1 + $0x1c8] ss:$76 sps:$4 sm:$0xff]   ;;  %v4182_v48 = vld [vmem:[%s5376_s1 + $0x264] ss:$76 sps:$4 sm:$0xff]  }
 0x14f   : > { %919 = vmatprep.subr.bf16.mxu1 %v4120_v15  ;;  %2987 = vmatprep.subr.bf16.mxu0 %v4164_v42  ;;  %v4180_v49 = vld [vmem:[%s5376_s1 + $0x260] ss:$76 sps:$4 sm:$0xff]   ;;  %v554_v53 = vld [vmem:[#allocation4] sm:$0x3]  ;;  %s3970_s4 = smul.u32 19, %s484_s29  ;;  %p542_p4 = scmp.lt.s32.totalorder %s541_s21, 37 }
 0x150   : > { %v559_v55 = vrot.slane %v554_v53, %v5399_v52  ;;  %v563_v56 = vrot.slane %v554_v53, %v5402_v54 }
 0x151   : > { %s5879_s21 = smov (!%p542_p4, %s541_s21), 37  ;;  %s5708_s23 = scalar_lea.vmem [#allocation16], %s3970_s4 }
 0x152   : > { %920 = vmatpush1.bf16.msra.mxu1 %v4122_v16  ;;  %2988 = vmatpush1.bf16.msra.mxu0 %v4162_v43  ;;  %s3599_s9 = sshll.u32 %s5879_s21, 3 }
 0x153   : > { %921 = vmatprep.subr.bf16.mxu1 %v4123_v17  ;;  %2989 = vmatprep.subr.bf16.mxu0 %v4170_v44  ;;  %s5732_s26 = scalar_lea.vmem %s5873_s12, %s3599_s9 }
 0x156   : > { %922 = vmatpush1.bf16.msra.mxu1 %v4125_v18  ;;  %2990 = vmatpush1.bf16.msra.mxu0 %v4168_v45 }
 0x157   : > { %923 = vmatprep.subr.bf16.mxu1 %v4126_v19  ;;  %2991 = vmatprep.subr.bf16.mxu0 %v4176_v46 }
 0x15a   : > { %924 = vmatpush1.bf16.msra.mxu1 %v4128_v20  ;;  %2992 = vmatpush1.bf16.msra.mxu0 %v4174_v47 }
 0x15b   : > { %925 = vmatprep.subr.bf16.mxu1 %v4129_v21  ;;  %2993 = vmatprep.subr.bf16.mxu0 %v4182_v48 }
 0x15e   : > { %926 = vmatpush1.bf16.msra.mxu1 %v4131_v22  ;;  %2994 = vmatpush1.bf16.msra.mxu0 %v4180_v49 }
 0x15f   : > { %927 = vmatprep.subr.bf16.mxu1 %v4132_v23 }
 0x162   : > { %928 = vmatpush1.bf16.msra.mxu1 %v4134_v24 }
 0x163   : > { %929 = vmatprep.subr.bf16.mxu1 %v4135_v25 }
 0x166   : > { %930 = vmatpush1.bf16.msra.mxu1 %v4137_v26 }
 0x167   : > { %931 = vmatprep.subr.bf16.mxu1 %v4138_v27 }
 0x16a   : > { %932 = vmatpush1.bf16.msra.mxu1 %v4140_v28 }
 0x16b   : > { %933 = vmatprep.subr.bf16.mxu1 %v4141_v29 }
 0x16e   : > { %934 = vmatpush1.bf16.msra.mxu1 %v4143_v30 }
 0x16f   : > { %935 = vmatprep.subr.bf16.mxu1 %v4144_v31 }
 0x172   : > { %936 = vmatpush1.bf16.msra.mxu1 %v4146_v32 }
 0x173   : > { %937 = vmatprep.subr.bf16.mxu1 %v4147_v33 }
 0x176   : > { %938 = vmatpush1.bf16.msra.mxu1 %v4149_v34 }
 0x177   : > { %939 = vmatprep.subr.bf16.mxu1 %v4150_v35 }
 0x17a   : > { %940 = vmatpush1.bf16.msra.mxu1 %v4152_v36 }
 0x17b   : > { %941 = vmatprep.subr.bf16.mxu1 %v4153_v37  ;;  %v675_v37 = vld [vmem:[#allocation6] sm:$0x3] }
 0x17c   : > { %v680_v40 = vrot.slane %v675_v37, %v5399_v52  ;;  %v684_v43 = vrot.slane %v675_v37, %v5402_v54  ;;  %v4236_v37 = vld [vmem:[%s5376_s1 + $0x7bc] ss:$76 sps:$4 sm:$0xff]  }
 0x17e   : > { %942 = vmatpush1.bf16.msra.mxu1 %v4155_v38  ;;  %v689_v38 = vld [vmem:[#allocation7] sm:$0x3] }
 0x17f   : > { %3026 = vmatprep.subr.bf16.mxu1 %v4161_v41  ;;  %v694_v45 = vrot.slane %v689_v38, %v5399_v52  ;;  %v698_v48 = vrot.slane %v689_v38, %v5402_v54  ;;  %v4239_v38 = vld [vmem:[%s5376_s1 + $0x7c4] ss:$76 sps:$4 sm:$0xff]  }
 0x21b   : > { %v624_v57 = vpop.f32.mrb[0].mxu0 }
 0x21c   : > { %v625_v58 = vadd.f32 %v624_v57, %v559_v55  ;;  %v626_v59 = vpop.f32.mrb[1].mxu0 }
 0x21d   : > { %v627_v60 = vadd.f32 %v626_v59, %v563_v56  ;;  %v628_v61 = vpop.f32.mrb[2].mxu0  ;;  %v4159_v59 = vld [vmem:[%s5376_s1 + $0x8] ss:$76 sps:$4 sm:$0xff]  }
 0x21e   : > { %v631_v62 = vrot.slane %v625_v58, 4  ;;  %v643_v63 = vmul.f32 %v625_v58, %v625_v58  ;;  %v629_v0 = vpop.f32.mrb[3].mxu0  ;;  %v4167_v61 = vld [vmem:[%s5376_s1 + $0xa4] ss:$76 sps:$4 sm:$0xff]  }
 0x21f   : > { %v637_v1 = vrot.slane %v627_v60, 4  ;;  %v644_v2 = vmul.f32 %v627_v60, %v627_v60  ;;  %v4171_v0 = vld [vmem:[%s5376_s1 + $0x138] ss:$76 sps:$4 sm:$0xff]  }
 0x220   : > { %v632_v3 = vadd.f32 %v631_v62, %v625_v58  ;;  %v645_v4 = vrot.slane %v643_v63, 4  ;;  %v4165_v62 = vld [vmem:[%s5376_s1 + $0xa0] ss:$76 sps:$4 sm:$0xff]  }
 0x221   : > { %v638_v5 = vadd.f32 %v637_v1, %v627_v60  ;;  %v651_v6 = vrot.slane %v644_v2, 4  ;;  %v4179_v1 = vld [vmem:[%s5376_s1 + $0x1d4] ss:$76 sps:$4 sm:$0xff]  }
 0x222   : > { %v633_v7 = vrot.slane %v632_v3, 2  ;;  %v646_v8 = vadd.f32 %v645_v4, %v643_v63  ;;  %v4173_v63 = vld [vmem:[%s5376_s1 + $0x13c] ss:$76 sps:$4 sm:$0xff]  }
 0x223   : > { %v639_v9 = vrot.slane %v638_v5, 2  ;;  %v652_v10 = vadd.f32 %v651_v6, %v644_v2  ;;  %v4177_v2 = vld [vmem:[%s5376_s1 + $0x1d0] ss:$76 sps:$4 sm:$0xff]   ;;  %v4183_v4 = vld [vmem:[%s5376_s1 + $0x268] ss:$76 sps:$4 sm:$0xff]  }
 0x224   : > { %v634_v11 = vadd.f32 %v633_v7, %v632_v3  ;;  %v647_v12 = vrot.slane %v646_v8, 2  ;;  %v4185_v3 = vld [vmem:[%s5376_s1 + $0x26c] ss:$76 sps:$4 sm:$0xff]   ;;  %v4191_v6 = vld [vmem:[%s5376_s1 + $0x304] ss:$76 sps:$4 sm:$0xff]  }
 0x225   : > { %v640_v13 = vadd.f32 %v639_v9, %v638_v5  ;;  %v653_v14 = vrot.slane %v652_v10, 2  ;;  %v4188_v5 = vld [vmem:[%s5376_s1 + $0x2fc] ss:$76 sps:$4 sm:$0xff]   ;;  %v4186_v7 = vld [vmem:[%s5376_s1 + $0x2f8] ss:$76 sps:$4 sm:$0xff]  }
 0x226   : > { %v635_v15 = vrot.slane %v634_v11, 1  ;;  %v648_v16 = vadd.f32 %v647_v12, %v646_v8  ;;  %v4189_v8 = vld [vmem:[%s5376_s1 + $0x300] ss:$76 sps:$4 sm:$0xff]   ;;  %2995 = vmatprep.subr.bf16.mxu0 %v4188_v5  ;;  %v4195_v12 = vld [vmem:[%s5376_s1 + $0x398] ss:$76 sps:$4 sm:$0xff]  }
 0x227   : > { %v654_v17 = vadd.f32 %v653_v14, %v652_v10  ;;  %v641_v18 = vrot.slane %v640_v13, 1  ;;  %2996 = vmatpush1.bf16.msra.mxu0 %v4186_v7  ;;  %v4194_v9 = vld [vmem:[%s5376_s1 + $0x394] ss:$76 sps:$4 sm:$0xff]   ;;  %v4197_v10 = vld [vmem:[%s5376_s1 + $0x39c] ss:$76 sps:$4 sm:$0xff]  }
 0x228   : > { %v636_v19 = vadd.f32 %v635_v15, %v634_v11  ;;  %v649_v20 = vrot.slane %v648_v16, 1  ;;  %v4192_v11 = vld [vmem:[%s5376_s1 + $0x390] ss:$76 sps:$4 sm:$0xff]   ;;  %2997 = vmatprep.subr.bf16.mxu0 %v4194_v9  ;;  %v4203_v14 = vld [vmem:[%s5376_s1 + $0x434] ss:$76 sps:$4 sm:$0xff]  }
 0x229   : > { %v655_v21 = vrot.slane %v654_v17, 1  ;;  %v642_v22 = vadd.f32 %v641_v18, %v640_v13  ;;  %v4200_v13 = vld [vmem:[%s5376_s1 + $0x42c] ss:$76 sps:$4 sm:$0xff]   ;;  %v4198_v15 = vld [vmem:[%s5376_s1 + $0x428] ss:$76 sps:$4 sm:$0xff]  }
 0x22a   : > { %v650_v23 = vadd.f32 %v649_v20, %v648_v16  ;;  %v657_v24 = vmul.f32 0.125, %v636_v19  ;;  %v4201_v16 = vld [vmem:[%s5376_s1 + $0x430] ss:$76 sps:$4 sm:$0xff]   ;;  %v4209_v18 = vld [vmem:[%s5376_s1 + $0x4cc] ss:$76 sps:$4 sm:$0xff]  }
 0x22b   : > { %v656_v25 = vadd.f32 %v655_v21, %v654_v17  ;;  %v658_v26 = vmul.f32 0.125, %v642_v22  ;;  %2998 = vmatpush1.bf16.msra.mxu0 %v4192_v11  ;;  %v4206_v17 = vld [vmem:[%s5376_s1 + $0x4c4] ss:$76 sps:$4 sm:$0xff]   ;;  %v4204_v19 = vld [vmem:[%s5376_s1 + $0x4c0] ss:$76 sps:$4 sm:$0xff]  }
 0x22c   : > { %v659_v27 = vmul.f32 0.125, %v650_v23  ;;  %v661_v28 = vmul.f32 %v657_v24, %v657_v24  ;;  %v667_v39 = vsub.f32 %v625_v58, %v657_v24  ;;  %2999 = vmatprep.subr.bf16.mxu0 %v4200_v13  ;;  %v4207_v20 = vld [vmem:[%s5376_s1 + $0x4c8] ss:$76 sps:$4 sm:$0xff]   ;;  %v4215_v22 = vld [vmem:[%s5376_s1 + $0x564] ss:$76 sps:$4 sm:$0xff]  }
 0x22d   : > { %v660_v29 = vmul.f32 0.125, %v656_v25  ;;  %v662_v30 = vmul.f32 %v658_v26, %v658_v26  ;;  %v668_v42 = vsub.f32 %v627_v60, %v658_v26  ;;  %v4212_v21 = vld [vmem:[%s5376_s1 + $0x55c] ss:$76 sps:$4 sm:$0xff]   ;;  %v4210_v23 = vld [vmem:[%s5376_s1 + $0x558] ss:$76 sps:$4 sm:$0xff]  }
 0x22e   : > { %v663_v31 = vsub.f32 %v659_v27, %v661_v28  ;;  %v4213_v24 = vld [vmem:[%s5376_s1 + $0x560] ss:$76 sps:$4 sm:$0xff]   ;;  %v4221_v26 = vld [vmem:[%s5376_s1 + $0x5fc] ss:$76 sps:$4 sm:$0xff]   ;;  %v4219_v28 = vld [vmem:[%s5376_s1 + $0x5f8] ss:$76 sps:$4 sm:$0xff]  }
 0x22f   : > { %v664_v32 = vsub.f32 %v660_v29, %v662_v30  ;;  %3000 = vmatpush1.bf16.msra.mxu0 %v4198_v15  ;;  %v4218_v25 = vld [vmem:[%s5376_s1 + $0x5f4] ss:$76 sps:$4 sm:$0xff]   ;;  %v4216_v27 = vld [vmem:[%s5376_s1 + $0x5f0] ss:$76 sps:$4 sm:$0xff]   ;;  %v4224_v29 = vld [vmem:[%s5376_s1 + $0x68c] ss:$76 sps:$4 sm:$0xff]  }
 0x230   : > { %v665_v33 = vmax.f32 %v663_v31, 0.0  ;;  %3001 = vmatprep.subr.bf16.mxu0 %v4206_v17  ;;  %v4227_v30 = vld [vmem:[%s5376_s1 + $0x694] ss:$76 sps:$4 sm:$0xff]  }
 0x231   : > { %v666_v34 = vmax.f32 %v664_v32, 0.0  ;;  %v4222_v31 = vld [vmem:[%s5376_s1 + $0x688] ss:$76 sps:$4 sm:$0xff]   ;;  %v4225_v32 = vld [vmem:[%s5376_s1 + $0x690] ss:$76 sps:$4 sm:$0xff]  }
 0x232   : > { %v669_v35 = vadd.f32 1e-05, %v665_v33  ;;  %v4230_v33 = vld [vmem:[%s5376_s1 + $0x724] ss:$76 sps:$4 sm:$0xff]  }
 0x233   : > { %v670_v36 = vadd.f32 1e-05, %v666_v34  ;;  %3002 = vmatpush1.bf16.msra.mxu0 %v4204_v19  ;;  %v4233_v34 = vld [vmem:[%s5376_s1 + $0x72c] ss:$76 sps:$4 sm:$0xff]  }
 0x234   : > { %4604 = vrsqrt.f32 %v669_v35  ;;  %3003 = vmatprep.subr.bf16.mxu0 %v4212_v21  ;;  %v4228_v35 = vld [vmem:[%s5376_s1 + $0x720] ss:$76 sps:$4 sm:$0xff]  }
 0x235   : > { %4606 = vrsqrt.f32 %v670_v36  ;;  %v4231_v36 = vld [vmem:[%s5376_s1 + $0x728] ss:$76 sps:$4 sm:$0xff]  }
 0x237   : > { %3004 = vmatpush1.bf16.msra.mxu0 %v4210_v23 }
 0x238   : > { %3005 = vmatprep.subr.bf16.mxu0 %v4218_v25 }
 0x23b   : > { %3006 = vmatpush1.bf16.msra.mxu0 %v4216_v27 }
 0x23c   : > { %3007 = vmatprep.subr.bf16.mxu0 %v4224_v29 }
 0x23e   : > { %v4605_v41 = vpop.eup %4604 }
 0x23f   : > { %v4607_v44 = vpop.eup %4606  ;;  %v673_v46 = vmul.f32 %v4605_v41, %v667_v39  ;;  %3008 = vmatpush1.bf16.msra.mxu0 %v4222_v31  ;;  %v4234_v39 = vld [vmem:[%s5376_s1 + $0x7b8] ss:$76 sps:$4 sm:$0xff]   ;;  %v4242_v41 = vld [vmem:[%s5376_s1 + $0x854] ss:$76 sps:$4 sm:$0xff]  }
 0x240   : > { %v674_v47 = vmul.f32 %v4607_v44, %v668_v42  ;;  %3009 = vmatprep.subr.bf16.mxu0 %v4230_v33  ;;  %v4245_v42 = vld [vmem:[%s5376_s1 + $0x85c] ss:$76 sps:$4 sm:$0xff]   ;;  %v4243_v44 = vld [vmem:[%s5376_s1 + $0x858] ss:$76 sps:$4 sm:$0xff]  }
 0x241   : > { %v687_v49 = vmul.f32 %v680_v40, %v673_v46  ;;  %v4237_v40 = vld [vmem:[%s5376_s1 + $0x7c0] ss:$76 sps:$4 sm:$0xff]  }
 0x242   : > { %v688_v50 = vmul.f32 %v684_v43, %v674_v47  ;;  %v4240_v43 = vld [vmem:[%s5376_s1 + $0x850] ss:$76 sps:$4 sm:$0xff]   ;;  %v4251_v46 = vld [vmem:[%s5376_s1 + $0x8f4] ss:$76 sps:$4 sm:$0xff]  }
 0x243   : > { %v701_v53 = vadd.f32 %v694_v45, %v687_v49  ;;  %3010 = vmatpush1.bf16.msra.mxu0 %v4228_v35  ;;  %v4248_v45 = vld [vmem:[%s5376_s1 + $0x8ec] ss:$76 sps:$4 sm:$0xff]   ;;  %v4246_v47 = vld [vmem:[%s5376_s1 + $0x8e8] ss:$76 sps:$4 sm:$0xff]  }
 0x244   : > { %v702_v55 = vadd.f32 %v698_v48, %v688_v50  ;;  %3011 = vmatprep.subr.bf16.mxu0 %v4236_v37  ;;  %v4249_v48 = vld [vmem:[%s5376_s1 + $0x8f0] ss:$76 sps:$4 sm:$0xff]   ;;  %v4254_v49 = vld [vmem:[%s5376_s1 + $0x14] ss:$76 sps:$4 sm:$0xff]  }
 0x245   : > { %v703_v56 = vmax.f32 %v701_v53, 0.0  ;;  %v4257_v50 = vld [vmem:[%s5376_s1 + $0x1c] ss:$76 sps:$4 sm:$0xff]   ;;  %v739_v53 = vld [vmem:[#allocation10] sm:$0x3] }
 0x246   : > { %v704_v57 = vmax.f32 %v702_v55, 0.0  ;;  %v744_v55 = vrot.slane %v739_v53, %v5399_v52  ;;  %v996_v37 = vld [vmem:[#allocation12] sm:$0x3] }
 0x247   : > { %v705_v60 = vpack.c.bf16 %v703_v56, %v703_v56  ;;  %3012 = vmatpush1.bf16.msra.mxu0 %v4234_v39  ;;  %v748_v56 = vrot.slane %v739_v53, %v5402_v54 }
 0x248   : > { %v706_v58 = vpack.c.bf16 %v704_v57, %v704_v57  ;;  %3013 = vmatprep.subr.bf16.mxu0 %v4242_v41 }
 0x24a   : > { %943 = vmatprep.mubr.bf16.mxu1 %v706_v58 }
 0x24b   : > { %944 = vmatmul.mubr.bf16.vlgmr.msra.gmra.mrb[0].mxu1 %v705_v60  ;;  %3014 = vmatpush1.bf16.msra.mxu0 %v4240_v43  ;;  %v1005_v43 = vrot.slane %v996_v37, %v5402_v54 }
 0x24c   : > { %3027 = vmatpush1.bf16.msra.mxu1 %v4159_v59  ;;  %3015 = vmatprep.subr.bf16.mxu0 %v4248_v45 }
 0x24d   : > { %3028 = vmatprep.subr.bf16.mxu1 %v4167_v61 }
 0x24f   : > { %3016 = vmatpush1.bf16.msra.mxu0 %v4246_v47 }
 0x250   : > { %3029 = vmatpush1.bf16.msra.mxu1 %v4165_v62  ;;  %3067 = vmatprep.subr.bf16.mxu0 %v4254_v49 }
 0x251   : > { %3030 = vmatprep.subr.bf16.mxu1 %v4173_v63 }
 0x254   : > { %3031 = vmatpush1.bf16.msra.mxu1 %v4171_v0 }
 0x255   : > { %3032 = vmatprep.subr.bf16.mxu1 %v4179_v1 }
 0x258   : > { %3033 = vmatpush1.bf16.msra.mxu1 %v4177_v2 }
 0x259   : > { %3034 = vmatprep.subr.bf16.mxu1 %v4185_v3 }
 0x25c   : > { %3035 = vmatpush1.bf16.msra.mxu1 %v4183_v4 }
 0x25d   : > { %3036 = vmatprep.subr.bf16.mxu1 %v4191_v6 }
 0x260   : > { %3037 = vmatpush1.bf16.msra.mxu1 %v4189_v8 }
 0x261   : > { %3038 = vmatprep.subr.bf16.mxu1 %v4197_v10 }
 0x264   : > { %3039 = vmatpush1.bf16.msra.mxu1 %v4195_v12 }
 0x265   : > { %3040 = vmatprep.subr.bf16.mxu1 %v4203_v14 }
 0x268   : > { %3041 = vmatpush1.bf16.msra.mxu1 %v4201_v16 }
 0x269   : > { %3042 = vmatprep.subr.bf16.mxu1 %v4209_v18 }
 0x26c   : > { %3043 = vmatpush1.bf16.msra.mxu1 %v4207_v20 }
 0x26d   : > { %3044 = vmatprep.subr.bf16.mxu1 %v4215_v22 }
 0x270   : > { %3045 = vmatpush1.bf16.msra.mxu1 %v4213_v24 }
 0x271   : > { %3046 = vmatprep.subr.bf16.mxu1 %v4221_v26 }
 0x274   : > { %3047 = vmatpush1.bf16.msra.mxu1 %v4219_v28 }
 0x275   : > { %3048 = vmatprep.subr.bf16.mxu1 %v4227_v30 }
 0x278   : > { %3049 = vmatpush1.bf16.msra.mxu1 %v4225_v32 }
 0x279   : > { %3050 = vmatprep.subr.bf16.mxu1 %v4233_v34 }
 0x27c   : > { %3051 = vmatpush1.bf16.msra.mxu1 %v4231_v36 }
 0x27d   : > { %3052 = vmatprep.subr.bf16.mxu1 %v4239_v38  ;;  %v1010_v38 = vld [vmem:[#allocation13] sm:$0x3] }
 0x280   : > { %3053 = vmatpush1.bf16.msra.mxu1 %v4237_v40  ;;  %v1001_v40 = vrot.slane %v996_v37, %v5399_v52  ;;  %v4315_v37 = vld [vmem:[%s5376_s1 + $0x608] ss:$76 sps:$4 sm:$0xff]  }
 0x281   : > { %3054 = vmatprep.subr.bf16.mxu1 %v4245_v42 }
 0x284   : > { %3055 = vmatpush1.bf16.msra.mxu1 %v4243_v44 }
 0x285   : > { %3056 = vmatprep.subr.bf16.mxu1 %v4251_v46  ;;  %v1015_v46 = vrot.slane %v1010_v38, %v5399_v52 }
 0x288   : > { %3057 = vmatpush1.bf16.msra.mxu1 %v4249_v48  ;;  %v1019_v48 = vrot.slane %v1010_v38, %v5402_v54  ;;  %v4320_v38 = vld [vmem:[%s5376_s1 + $0x69c] ss:$76 sps:$4 sm:$0xff]  }
 0x289   : > { %3108 = vmatprep.subr.bf16.mxu1 %v4257_v50 }
 0x31e   : > { %v945_v57 = vpop.f32.mrb[0].mxu1 }
 0x31f   : > { %v946_v58 = vadd.f32 %v945_v57, %v744_v55  ;;  %v947_v59 = vpop.f32.mrb[1].mxu1 }
 0x320   : > { %v948_v60 = vadd.f32 %v947_v59, %v748_v56  ;;  %v949_v61 = vpop.f32.mrb[2].mxu1  ;;  %v4252_v59 = vld [vmem:[%s5376_s1 + $0x10] ss:$76 sps:$4 sm:$0xff]  }
 0x321   : > { %v952_v62 = vrot.slane %v946_v58, 4  ;;  %v964_v63 = vmul.f32 %v946_v58, %v946_v58  ;;  %v950_v0 = vpop.f32.mrb[3].mxu1 }
 0x322   : > { %v958_v1 = vrot.slane %v948_v60, 4  ;;  %v965_v2 = vmul.f32 %v948_v60, %v948_v60  ;;  %v4258_v0 = vld [vmem:[%s5376_s1 + $0xa8] ss:$76 sps:$4 sm:$0xff]  }
 0x323   : > { %v953_v3 = vadd.f32 %v952_v62, %v946_v58  ;;  %v966_v4 = vrot.slane %v964_v63, 4  ;;  %v4260_v62 = vld [vmem:[%s5376_s1 + $0xac] ss:$76 sps:$4 sm:$0xff]  }
 0x324   : > { %v959_v5 = vadd.f32 %v958_v1, %v948_v60  ;;  %v972_v6 = vrot.slane %v965_v2, 4  ;;  %v4261_v1 = vld [vmem:[%s5376_s1 + $0xb0] ss:$76 sps:$4 sm:$0xff]  }
 0x325   : > { %v954_v7 = vrot.slane %v953_v3, 2  ;;  %v967_v8 = vadd.f32 %v966_v4, %v964_v63  ;;  %v4263_v63 = vld [vmem:[%s5376_s1 + $0xb4] ss:$76 sps:$4 sm:$0xff]  }
 0x326   : > { %v960_v9 = vrot.slane %v959_v5, 2  ;;  %v973_v10 = vadd.f32 %v972_v6, %v965_v2  ;;  %v4266_v2 = vld [vmem:[%s5376_s1 + $0x144] ss:$76 sps:$4 sm:$0xff]   ;;  %v4264_v4 = vld [vmem:[%s5376_s1 + $0x140] ss:$76 sps:$4 sm:$0xff]  }
 0x327   : > { %v955_v11 = vadd.f32 %v954_v7, %v953_v3  ;;  %v968_v12 = vrot.slane %v967_v8, 2  ;;  %v4269_v3 = vld [vmem:[%s5376_s1 + $0x14c] ss:$76 sps:$4 sm:$0xff]   ;;  %v4272_v6 = vld [vmem:[%s5376_s1 + $0x1dc] ss:$76 sps:$4 sm:$0xff]  }
 0x328   : > { %v961_v13 = vadd.f32 %v960_v9, %v959_v5  ;;  %v974_v14 = vrot.slane %v973_v10, 2  ;;  %v4267_v5 = vld [vmem:[%s5376_s1 + $0x148] ss:$76 sps:$4 sm:$0xff]   ;;  %v4275_v7 = vld [vmem:[%s5376_s1 + $0x1e4] ss:$76 sps:$4 sm:$0xff]  }
 0x329   : > { %v956_v15 = vrot.slane %v955_v11, 1  ;;  %v969_v16 = vadd.f32 %v968_v12, %v967_v8  ;;  %v4270_v8 = vld [vmem:[%s5376_s1 + $0x1d8] ss:$76 sps:$4 sm:$0xff]   ;;  %v4273_v9 = vld [vmem:[%s5376_s1 + $0x1e0] ss:$76 sps:$4 sm:$0xff]  }
 0x32a   : > { %v962_v17 = vrot.slane %v961_v13, 1  ;;  %v975_v18 = vadd.f32 %v974_v14, %v973_v10  ;;  %v4278_v10 = vld [vmem:[%s5376_s1 + $0x274] ss:$76 sps:$4 sm:$0xff]   ;;  %v4276_v12 = vld [vmem:[%s5376_s1 + $0x270] ss:$76 sps:$4 sm:$0xff]  }
 0x32b   : > { %v957_v19 = vadd.f32 %v956_v15, %v955_v11  ;;  %v970_v20 = vrot.slane %v969_v16, 1  ;;  %v4281_v11 = vld [vmem:[%s5376_s1 + $0x27c] ss:$76 sps:$4 sm:$0xff]   ;;  %v4284_v14 = vld [vmem:[%s5376_s1 + $0x30c] ss:$76 sps:$4 sm:$0xff]  }
 0x32c   : > { %v963_v21 = vadd.f32 %v962_v17, %v961_v13  ;;  %v976_v22 = vrot.slane %v975_v18, 1  ;;  %v4279_v13 = vld [vmem:[%s5376_s1 + $0x278] ss:$76 sps:$4 sm:$0xff]   ;;  %v4287_v15 = vld [vmem:[%s5376_s1 + $0x314] ss:$76 sps:$4 sm:$0xff]  }
 0x32d   : > { %v971_v23 = vadd.f32 %v970_v20, %v969_v16  ;;  %v978_v24 = vmul.f32 0.125, %v957_v19  ;;  %v4282_v16 = vld [vmem:[%s5376_s1 + $0x308] ss:$76 sps:$4 sm:$0xff]   ;;  %v4285_v17 = vld [vmem:[%s5376_s1 + $0x310] ss:$76 sps:$4 sm:$0xff]  }
 0x32e   : > { %v977_v25 = vadd.f32 %v976_v22, %v975_v18  ;;  %v979_v26 = vmul.f32 0.125, %v963_v21  ;;  %v4290_v18 = vld [vmem:[%s5376_s1 + $0x3a4] ss:$76 sps:$4 sm:$0xff]   ;;  %v4293_v19 = vld [vmem:[%s5376_s1 + $0x3ac] ss:$76 sps:$4 sm:$0xff]  }
 0x32f   : > { %v980_v27 = vmul.f32 0.125, %v971_v23  ;;  %v982_v28 = vmul.f32 %v978_v24, %v978_v24  ;;  %v988_v39 = vsub.f32 %v946_v58, %v978_v24  ;;  %v4288_v20 = vld [vmem:[%s5376_s1 + $0x3a0] ss:$76 sps:$4 sm:$0xff]   ;;  %v4291_v21 = vld [vmem:[%s5376_s1 + $0x3a8] ss:$76 sps:$4 sm:$0xff]  }
 0x330   : > { %v981_v29 = vmul.f32 0.125, %v977_v25  ;;  %v983_v30 = vmul.f32 %v979_v26, %v979_v26  ;;  %v989_v42 = vsub.f32 %v948_v60, %v979_v26  ;;  %v4255_v60 = vld [vmem:[%s5376_s1 + $0x18] ss:$76 sps:$4 sm:$0xff]   ;;  %v4296_v22 = vld [vmem:[%s5376_s1 + $0x43c] ss:$76 sps:$4 sm:$0xff]  }
 0x331   : > { %v984_v31 = vsub.f32 %v980_v27, %v982_v28  ;;  %v4299_v23 = vld [vmem:[%s5376_s1 + $0x444] ss:$76 sps:$4 sm:$0xff]   ;;  %v4297_v25 = vld [vmem:[%s5376_s1 + $0x440] ss:$76 sps:$4 sm:$0xff]   ;;  %v4305_v27 = vld [vmem:[%s5376_s1 + $0x4dc] ss:$76 sps:$4 sm:$0xff]  }
 0x332   : > { %v985_v32 = vsub.f32 %v981_v29, %v983_v30  ;;  %v4294_v24 = vld [vmem:[%s5376_s1 + $0x438] ss:$76 sps:$4 sm:$0xff]   ;;  %v4302_v26 = vld [vmem:[%s5376_s1 + $0x4d4] ss:$76 sps:$4 sm:$0xff]   ;;  %v4300_v28 = vld [vmem:[%s5376_s1 + $0x4d0] ss:$76 sps:$4 sm:$0xff]  }
 0x333   : > { %v986_v33 = vmax.f32 %v984_v31, 0.0  ;;  %v4303_v29 = vld [vmem:[%s5376_s1 + $0x4d8] ss:$76 sps:$4 sm:$0xff]   ;;  %v4311_v31 = vld [vmem:[%s5376_s1 + $0x574] ss:$76 sps:$4 sm:$0xff]  }
 0x334   : > { %v987_v34 = vmax.f32 %v985_v32, 0.0  ;;  %v4308_v30 = vld [vmem:[%s5376_s1 + $0x56c] ss:$76 sps:$4 sm:$0xff]   ;;  %v4306_v32 = vld [vmem:[%s5376_s1 + $0x568] ss:$76 sps:$4 sm:$0xff]  }
 0x335   : > { %v990_v35 = vadd.f32 1e-05, %v986_v33  ;;  %v4309_v33 = vld [vmem:[%s5376_s1 + $0x570] ss:$76 sps:$4 sm:$0xff]  }
 0x336   : > { %v991_v36 = vadd.f32 1e-05, %v987_v34  ;;  %v4314_v34 = vld [vmem:[%s5376_s1 + $0x604] ss:$76 sps:$4 sm:$0xff]  }
 0x337   : > { %4608 = vrsqrt.f32 %v990_v35  ;;  %v4317_v35 = vld [vmem:[%s5376_s1 + $0x60c] ss:$76 sps:$4 sm:$0xff]  }
 0x338   : > { %4610 = vrsqrt.f32 %v991_v36  ;;  %v4312_v36 = vld [vmem:[%s5376_s1 + $0x600] ss:$76 sps:$4 sm:$0xff]  }
 0x341   : > { %v4609_v41 = vpop.eup %4608 }
 0x342   : > { %v4611_v44 = vpop.eup %4610  ;;  %v994_v45 = vmul.f32 %v4609_v41, %v988_v39  ;;  %v4323_v39 = vld [vmem:[%s5376_s1 + $0x6a4] ss:$76 sps:$4 sm:$0xff]   ;;  %v4321_v41 = vld [vmem:[%s5376_s1 + $0x6a0] ss:$76 sps:$4 sm:$0xff]  }
 0x343   : > { %v995_v47 = vmul.f32 %v4611_v44, %v989_v42  ;;  %v4326_v42 = vld [vmem:[%s5376_s1 + $0x734] ss:$76 sps:$4 sm:$0xff]   ;;  %v4324_v44 = vld [vmem:[%s5376_s1 + $0x730] ss:$76 sps:$4 sm:$0xff]  }
 0x344   : > { %v1008_v49 = vmul.f32 %v1001_v40, %v994_v45  ;;  %v4318_v40 = vld [vmem:[%s5376_s1 + $0x698] ss:$76 sps:$4 sm:$0xff]  }
 0x345   : > { %v1009_v50 = vmul.f32 %v1005_v43, %v995_v47  ;;  %v4329_v43 = vld [vmem:[%s5376_s1 + $0x73c] ss:$76 sps:$4 sm:$0xff]   ;;  %v4327_v45 = vld [vmem:[%s5376_s1 + $0x738] ss:$76 sps:$4 sm:$0xff]   ;;  %v4335_v47 = vld [vmem:[%s5376_s1 + $0x7d4] ss:$76 sps:$4 sm:$0xff]  }
 0x346   : > { %v1022_v53 = vadd.f32 %v1015_v46, %v1008_v49  ;;  %v4332_v46 = vld [vmem:[%s5376_s1 + $0x7cc] ss:$76 sps:$4 sm:$0xff]   ;;  %v4333_v49 = vld [vmem:[%s5376_s1 + $0x7d0] ss:$76 sps:$4 sm:$0xff]  }
 0x347   : > { %v1023_v55 = vadd.f32 %v1019_v48, %v1009_v50  ;;  %v4330_v48 = vld [vmem:[%s5376_s1 + $0x7c8] ss:$76 sps:$4 sm:$0xff]   ;;  %v4338_v50 = vld [vmem:[%s5376_s1 + $0x864] ss:$76 sps:$4 sm:$0xff]  }
 0x348   : > { %v1024_v56 = vmax.f32 %v1022_v53, 0.0  ;;  %v4341_v53 = vld [vmem:[%s5376_s1 + $0x86c] ss:$76 sps:$4 sm:$0xff]  }
 0x349   : > { %v1025_v57 = vmax.f32 %v1023_v55, 0.0  ;;  %v4336_v55 = vld [vmem:[%s5376_s1 + $0x860] ss:$76 sps:$4 sm:$0xff]  }
 0x34a   : > { %v5475_v61 = vpack.c.bf16 %v1024_v56, %v1024_v56  ;;  %v4339_v56 = vld [vmem:[%s5376_s1 + $0x868] ss:$76 sps:$4 sm:$0xff]  }
 0x34b   : > { %v5471_v58 = vpack.c.bf16 %v1025_v57, %v1025_v57  ;;  %v4344_v57 = vld [vmem:[%s5376_s1 + $0x8fc] ss:$76 sps:$4 sm:$0xff]  }
 0x34d   : > { %3017 = vmatprep.mubr.bf16.mxu0 %v5471_v58  ;;  %3058 = vmatprep.mubr.bf16.mxu1 %v5471_v58 }
 0x34e   : > { %3018 = vmatmul.mubr.bf16.vlgmr.msra.gmra.mrb[4].mxu0 %v5475_v61  ;;  %3059 = vmatmul.mubr.bf16.vlgmr.msra.gmra.mrb[4].mxu1 %v5475_v61 }
 0x34f   : > { %3068 = vmatpush1.bf16.msra.mxu0 %v4252_v59  ;;  %3109 = vmatpush1.bf16.msra.mxu1 %v4255_v60  ;;  %v4347_v59 = vld [vmem:[%s5376_s1 + $0x904] ss:$76 sps:$4 sm:$0xff]  }
 0x350   : > { %3099 = vmatprep.mubr.bf16.mxu0 %v5471_v58  ;;  %3140 = vmatprep.mubr.bf16.mxu1 %v5471_v58  ;;  %v4342_v60 = vld [vmem:[%s5376_s1 + $0x8f8] ss:$76 sps:$4 sm:$0xff]  }
 0x351   : > { %3069 = vmatprep.subr.bf16.mxu0 %v4260_v62  ;;  %3110 = vmatprep.subr.bf16.mxu1 %v4263_v63  ;;  %v4345_v62 = vld [vmem:[%s5376_s1 + $0x900] ss:$76 sps:$4 sm:$0xff]   ;;  %v4350_v63 = vld [vmem:[%s5376_s1 + $0x24] ss:$76 sps:$4 sm:$0xff]  }
 0x353   : > { %3070 = vmatpush1.bf16.msra.mxu0 %v4258_v0  ;;  %3111 = vmatpush1.bf16.msra.mxu1 %v4261_v1  ;;  %v4353_v0 = vld [vmem:[%s5376_s1 + $0x2c] ss:$76 sps:$4 sm:$0xff]  }
 0x354   : > { %3071 = vmatprep.subr.bf16.mxu0 %v4266_v2  ;;  %3112 = vmatprep.subr.bf16.mxu1 %v4269_v3  ;;  %v4348_v1 = vld [vmem:[%s5376_s1 + $0x20] ss:$76 sps:$4 sm:$0xff]   ;;  %v4351_v2 = vld [vmem:[%s5376_s1 + $0x28] ss:$76 sps:$4 sm:$0xff]  }
 0x355   : > { %v4356_v3 = vld [vmem:[%s5376_s1 + $0xbc] ss:$76 sps:$4 sm:$0xff]  }
 0x357   : > { %3072 = vmatpush1.bf16.msra.mxu0 %v4264_v4  ;;  %3113 = vmatpush1.bf16.msra.mxu1 %v4267_v5  ;;  %v4359_v4 = vld [vmem:[%s5376_s1 + $0xc4] ss:$76 sps:$4 sm:$0xff]  }
 0x358   : > { %3073 = vmatprep.subr.bf16.mxu0 %v4272_v6  ;;  %3114 = vmatprep.subr.bf16.mxu1 %v4275_v7  ;;  %v4354_v5 = vld [vmem:[%s5376_s1 + $0xb8] ss:$76 sps:$4 sm:$0xff]   ;;  %v4357_v6 = vld [vmem:[%s5376_s1 + $0xc0] ss:$76 sps:$4 sm:$0xff]  }
 0x359   : > { %v4362_v7 = vld [vmem:[%s5376_s1 + $0x154] ss:$76 sps:$4 sm:$0xff]  }
 0x35b   : > { %3074 = vmatpush1.bf16.msra.mxu0 %v4270_v8  ;;  %3115 = vmatpush1.bf16.msra.mxu1 %v4273_v9  ;;  %v4365_v8 = vld [vmem:[%s5376_s1 + $0x15c] ss:$76 sps:$4 sm:$0xff]  }
 0x35c   : > { %3075 = vmatprep.subr.bf16.mxu0 %v4278_v10  ;;  %3116 = vmatprep.subr.bf16.mxu1 %v4281_v11  ;;  %v4360_v9 = vld [vmem:[%s5376_s1 + $0x150] ss:$76 sps:$4 sm:$0xff]   ;;  %v4363_v10 = vld [vmem:[%s5376_s1 + $0x158] ss:$76 sps:$4 sm:$0xff]  }
 0x35d   : > { %v4368_v11 = vld [vmem:[%s5376_s1 + $0x1ec] ss:$76 sps:$4 sm:$0xff]  }
 0x35f   : > { %3076 = vmatpush1.bf16.msra.mxu0 %v4276_v12  ;;  %3117 = vmatpush1.bf16.msra.mxu1 %v4279_v13  ;;  %v4371_v12 = vld [vmem:[%s5376_s1 + $0x1f4] ss:$76 sps:$4 sm:$0xff]  }
 0x360   : > { %3077 = vmatprep.subr.bf16.mxu0 %v4284_v14  ;;  %3118 = vmatprep.subr.bf16.mxu1 %v4287_v15  ;;  %v4366_v13 = vld [vmem:[%s5376_s1 + $0x1e8] ss:$76 sps:$4 sm:$0xff]   ;;  %v4369_v14 = vld [vmem:[%s5376_s1 + $0x1f0] ss:$76 sps:$4 sm:$0xff]  }
 0x361   : > { %v4374_v15 = vld [vmem:[%s5376_s1 + $0x284] ss:$76 sps:$4 sm:$0xff]  }
 0x363   : > { %3078 = vmatpush1.bf16.msra.mxu0 %v4282_v16  ;;  %3119 = vmatpush1.bf16.msra.mxu1 %v4285_v17  ;;  %v4377_v16 = vld [vmem:[%s5376_s1 + $0x28c] ss:$76 sps:$4 sm:$0xff]  }
 0x364   : > { %3079 = vmatprep.subr.bf16.mxu0 %v4290_v18  ;;  %3120 = vmatprep.subr.bf16.mxu1 %v4293_v19  ;;  %v4372_v17 = vld [vmem:[%s5376_s1 + $0x280] ss:$76 sps:$4 sm:$0xff]   ;;  %v4375_v18 = vld [vmem:[%s5376_s1 + $0x288] ss:$76 sps:$4 sm:$0xff]  }
 0x365   : > { %v4380_v19 = vld [vmem:[%s5376_s1 + $0x31c] ss:$76 sps:$4 sm:$0xff]  }
 0x367   : > { %3080 = vmatpush1.bf16.msra.mxu0 %v4288_v20  ;;  %3121 = vmatpush1.bf16.msra.mxu1 %v4291_v21  ;;  %v4383_v20 = vld [vmem:[%s5376_s1 + $0x324] ss:$76 sps:$4 sm:$0xff]  }
 0x368   : > { %3081 = vmatprep.subr.bf16.mxu0 %v4296_v22  ;;  %3122 = vmatprep.subr.bf16.mxu1 %v4299_v23  ;;  %v4378_v21 = vld [vmem:[%s5376_s1 + $0x318] ss:$76 sps:$4 sm:$0xff]   ;;  %v4381_v22 = vld [vmem:[%s5376_s1 + $0x320] ss:$76 sps:$4 sm:$0xff]  }
 0x369   : > { %v4386_v23 = vld [vmem:[%s5376_s1 + $0x3b4] ss:$76 sps:$4 sm:$0xff]  }
 0x36b   : > { %3082 = vmatpush1.bf16.msra.mxu0 %v4294_v24  ;;  %3123 = vmatpush1.bf16.msra.mxu1 %v4297_v25  ;;  %v4389_v24 = vld [vmem:[%s5376_s1 + $0x3bc] ss:$76 sps:$4 sm:$0xff]  }
 0x36c   : > { %3083 = vmatprep.subr.bf16.mxu0 %v4302_v26  ;;  %3124 = vmatprep.subr.bf16.mxu1 %v4305_v27  ;;  %v4384_v25 = vld [vmem:[%s5376_s1 + $0x3b0] ss:$76 sps:$4 sm:$0xff]   ;;  %v4387_v26 = vld [vmem:[%s5376_s1 + $0x3b8] ss:$76 sps:$4 sm:$0xff]  }
 0x36d   : > { %v4392_v27 = vld [vmem:[%s5376_s1 + $0x44c] ss:$76 sps:$4 sm:$0xff]  }
 0x36f   : > { %3084 = vmatpush1.bf16.msra.mxu0 %v4300_v28  ;;  %3125 = vmatpush1.bf16.msra.mxu1 %v4303_v29  ;;  %v4395_v28 = vld [vmem:[%s5376_s1 + $0x454] ss:$76 sps:$4 sm:$0xff]  }
 0x370   : > { %3085 = vmatprep.subr.bf16.mxu0 %v4308_v30  ;;  %3126 = vmatprep.subr.bf16.mxu1 %v4311_v31  ;;  %v4390_v29 = vld [vmem:[%s5376_s1 + $0x448] ss:$76 sps:$4 sm:$0xff]   ;;  %v4393_v30 = vld [vmem:[%s5376_s1 + $0x450] ss:$76 sps:$4 sm:$0xff]  }
 0x371   : > { %v4398_v31 = vld [vmem:[%s5376_s1 + $0x4e4] ss:$76 sps:$4 sm:$0xff]  }
 0x373   : > { %3086 = vmatpush1.bf16.msra.mxu0 %v4306_v32  ;;  %3127 = vmatpush1.bf16.msra.mxu1 %v4309_v33  ;;  %v4401_v32 = vld [vmem:[%s5376_s1 + $0x4ec] ss:$76 sps:$4 sm:$0xff]  }
 0x374   : > { %3087 = vmatprep.subr.bf16.mxu0 %v4314_v34  ;;  %3128 = vmatprep.subr.bf16.mxu1 %v4317_v35  ;;  %v4396_v33 = vld [vmem:[%s5376_s1 + $0x4e0] ss:$76 sps:$4 sm:$0xff]   ;;  %v4399_v34 = vld [vmem:[%s5376_s1 + $0x4e8] ss:$76 sps:$4 sm:$0xff]  }
 0x375   : > { %v4404_v35 = vld [vmem:[%s5376_s1 + $0x57c] ss:$76 sps:$4 sm:$0xff]  }
 0x377   : > { %3088 = vmatpush1.bf16.msra.mxu0 %v4312_v36  ;;  %3129 = vmatpush1.bf16.msra.mxu1 %v4315_v37  ;;  %v4407_v36 = vld [vmem:[%s5376_s1 + $0x584] ss:$76 sps:$4 sm:$0xff]  }
 0x378   : > { %3089 = vmatprep.subr.bf16.mxu0 %v4320_v38  ;;  %3130 = vmatprep.subr.bf16.mxu1 %v4323_v39  ;;  %v4402_v37 = vld [vmem:[%s5376_s1 + $0x578] ss:$76 sps:$4 sm:$0xff]   ;;  %v4405_v38 = vld [vmem:[%s5376_s1 + $0x580] ss:$76 sps:$4 sm:$0xff]  }
 0x379   : > { %v4410_v39 = vld [vmem:[%s5376_s1 + $0x614] ss:$76 sps:$4 sm:$0xff]  }
 0x37b   : > { %3090 = vmatpush1.bf16.msra.mxu0 %v4318_v40  ;;  %3131 = vmatpush1.bf16.msra.mxu1 %v4321_v41  ;;  %v4413_v40 = vld [vmem:[%s5376_s1 + $0x61c] ss:$76 sps:$4 sm:$0xff]  }
 0x37c   : > { %3091 = vmatprep.subr.bf16.mxu0 %v4326_v42  ;;  %3132 = vmatprep.subr.bf16.mxu1 %v4329_v43  ;;  %v4408_v41 = vld [vmem:[%s5376_s1 + $0x610] ss:$76 sps:$4 sm:$0xff]   ;;  %v4411_v42 = vld [vmem:[%s5376_s1 + $0x618] ss:$76 sps:$4 sm:$0xff]  }
 0x37d   : > { %v4416_v43 = vld [vmem:[%s5376_s1 + $0x6ac] ss:$76 sps:$4 sm:$0xff]  }
 0x37f   : > { %3092 = vmatpush1.bf16.msra.mxu0 %v4324_v44  ;;  %3133 = vmatpush1.bf16.msra.mxu1 %v4327_v45  ;;  %v4419_v44 = vld [vmem:[%s5376_s1 + $0x6b4] ss:$76 sps:$4 sm:$0xff]  }
 0x380   : > { %3093 = vmatprep.subr.bf16.mxu0 %v4332_v46  ;;  %3134 = vmatprep.subr.bf16.mxu1 %v4335_v47  ;;  %v4414_v45 = vld [vmem:[%s5376_s1 + $0x6a8] ss:$76 sps:$4 sm:$0xff]   ;;  %v4417_v46 = vld [vmem:[%s5376_s1 + $0x6b0] ss:$76 sps:$4 sm:$0xff]  }
 0x381   : > { %v4422_v47 = vld [vmem:[%s5376_s1 + $0x744] ss:$76 sps:$4 sm:$0xff]  }
 0x383   : > { %3094 = vmatpush1.bf16.msra.mxu0 %v4330_v48  ;;  %3135 = vmatpush1.bf16.msra.mxu1 %v4333_v49  ;;  %v4425_v48 = vld [vmem:[%s5376_s1 + $0x74c] ss:$76 sps:$4 sm:$0xff]  }
 0x384   : > { %3095 = vmatprep.subr.bf16.mxu0 %v4338_v50  ;;  %3136 = vmatprep.subr.bf16.mxu1 %v4341_v53  ;;  %v4420_v49 = vld [vmem:[%s5376_s1 + $0x740] ss:$76 sps:$4 sm:$0xff]   ;;  %v4423_v50 = vld [vmem:[%s5376_s1 + $0x748] ss:$76 sps:$4 sm:$0xff]  }
 0x385   : > { %v4428_v53 = vld [vmem:[%s5376_s1 + $0x7dc] ss:$76 sps:$4 sm:$0xff]  }
 0x387   : > { %3096 = vmatpush1.bf16.msra.mxu0 %v4336_v55  ;;  %3137 = vmatpush1.bf16.msra.mxu1 %v4339_v56  ;;  %v4431_v55 = vld [vmem:[%s5376_s1 + $0x7e4] ss:$76 sps:$4 sm:$0xff]  }
 0x388   : > { %3097 = vmatprep.subr.bf16.mxu0 %v4344_v57  ;;  %3138 = vmatprep.subr.bf16.mxu1 %v4347_v59  ;;  %v4426_v56 = vld [vmem:[%s5376_s1 + $0x7d8] ss:$76 sps:$4 sm:$0xff]   ;;  %v4429_v57 = vld [vmem:[%s5376_s1 + $0x7e0] ss:$76 sps:$4 sm:$0xff]  }
 0x389   : > { %v4434_v59 = vld [vmem:[%s5376_s1 + $0x874] ss:$76 sps:$4 sm:$0xff]  }
 0x38b   : > { %3098 = vmatpush1.bf16.msra.mxu0 %v4342_v60  ;;  %3139 = vmatpush1.bf16.msra.mxu1 %v4345_v62  ;;  %v4437_v60 = vld [vmem:[%s5376_s1 + $0x87c] ss:$76 sps:$4 sm:$0xff]  }
 0x38c   : > { %3149 = vmatprep.subr.bf16.mxu0 %v4350_v63  ;;  %3190 = vmatprep.subr.bf16.mxu1 %v4353_v0  ;;  %v4432_v62 = vld [vmem:[%s5376_s1 + $0x870] ss:$76 sps:$4 sm:$0xff]   ;;  %v4435_v63 = vld [vmem:[%s5376_s1 + $0x878] ss:$76 sps:$4 sm:$0xff]  }
 0x38d   : > { %v4440_v0 = vld [vmem:[%s5376_s1 + $0x90c] ss:$76 sps:$4 sm:$0xff]  }
 0x38e   : > { %3100 = vmatmul.mubr.bf16.vlgmr.msra.gmra.mrb[8].mxu0 %v5475_v61  ;;  %3141 = vmatmul.mubr.bf16.vlgmr.msra.gmra.mrb[8].mxu1 %v5475_v61 }
 0x38f   : > { %3150 = vmatpush1.bf16.msra.mxu0 %v4348_v1  ;;  %3181 = vmatprep.mubr.bf16.mxu0 %v5471_v58  ;;  %v4443_v1 = vld [vmem:[%s5376_s1 + $0x914] ss:$76 sps:$4 sm:$0xff]  }
 0x390   : > { %3191 = vmatpush1.bf16.msra.mxu1 %v4351_v2  ;;  %3222 = vmatprep.mubr.bf16.mxu1 %v5471_v58  ;;  %v4438_v2 = vld [vmem:[%s5376_s1 + $0x908] ss:$76 sps:$4 sm:$0xff]  }
 0x391   : > { %3151 = vmatprep.subr.bf16.mxu0 %v4356_v3  ;;  %3192 = vmatprep.subr.bf16.mxu1 %v4359_v4  ;;  %v4441_v3 = vld [vmem:[%s5376_s1 + $0x910] ss:$76 sps:$4 sm:$0xff]   ;;  %v4446_v4 = vld [vmem:[%s5376_s1 + $0x34] ss:$76 sps:$4 sm:$0xff]  }
 0x393   : > { %3152 = vmatpush1.bf16.msra.mxu0 %v4354_v5  ;;  %v4449_v5 = vld [vmem:[%s5376_s1 + $0x3c] ss:$76 sps:$4 sm:$0xff]  }
 0x394   : > { %3193 = vmatpush1.bf16.msra.mxu1 %v4357_v6  ;;  %3153 = vmatprep.subr.bf16.mxu0 %v4362_v7  ;;  %v4444_v6 = vld [vmem:[%s5376_s1 + $0x30] ss:$76 sps:$4 sm:$0xff]   ;;  %v4447_v7 = vld [vmem:[%s5376_s1 + $0x38] ss:$76 sps:$4 sm:$0xff]  }
 0x395   : > { %3194 = vmatprep.subr.bf16.mxu1 %v4365_v8  ;;  %v4452_v8 = vld [vmem:[%s5376_s1 + $0xcc] ss:$76 sps:$4 sm:$0xff]  }
 0x397   : > { %3154 = vmatpush1.bf16.msra.mxu0 %v4360_v9  ;;  %v4455_v9 = vld [vmem:[%s5376_s1 + $0xd4] ss:$76 sps:$4 sm:$0xff]  }
 0x398   : > { %3195 = vmatpush1.bf16.msra.mxu1 %v4363_v10  ;;  %3155 = vmatprep.subr.bf16.mxu0 %v4368_v11  ;;  %v4450_v10 = vld [vmem:[%s5376_s1 + $0xc8] ss:$76 sps:$4 sm:$0xff]   ;;  %v4453_v11 = vld [vmem:[%s5376_s1 + $0xd0] ss:$76 sps:$4 sm:$0xff]  }
 0x399   : > { %3196 = vmatprep.subr.bf16.mxu1 %v4371_v12  ;;  %v4458_v12 = vld [vmem:[%s5376_s1 + $0x164] ss:$76 sps:$4 sm:$0xff]  }
 0x39b   : > { %3156 = vmatpush1.bf16.msra.mxu0 %v4366_v13  ;;  %v4461_v13 = vld [vmem:[%s5376_s1 + $0x16c] ss:$76 sps:$4 sm:$0xff]  }
 0x39c   : > { %3197 = vmatpush1.bf16.msra.mxu1 %v4369_v14  ;;  %3157 = vmatprep.subr.bf16.mxu0 %v4374_v15  ;;  %v4456_v14 = vld [vmem:[%s5376_s1 + $0x160] ss:$76 sps:$4 sm:$0xff]   ;;  %v4459_v15 = vld [vmem:[%s5376_s1 + $0x168] ss:$76 sps:$4 sm:$0xff]  }
 0x39d   : > { %3198 = vmatprep.subr.bf16.mxu1 %v4377_v16  ;;  %v4464_v16 = vld [vmem:[%s5376_s1 + $0x1fc] ss:$76 sps:$4 sm:$0xff]  }
 0x39f   : > { %3158 = vmatpush1.bf16.msra.mxu0 %v4372_v17  ;;  %v4467_v17 = vld [vmem:[%s5376_s1 + $0x204] ss:$76 sps:$4 sm:$0xff]  }
 0x3a0   : > { %3199 = vmatpush1.bf16.msra.mxu1 %v4375_v18  ;;  %3159 = vmatprep.subr.bf16.mxu0 %v4380_v19  ;;  %v4462_v18 = vld [vmem:[%s5376_s1 + $0x1f8] ss:$76 sps:$4 sm:$0xff]   ;;  %v4465_v19 = vld [vmem:[%s5376_s1 + $0x200] ss:$76 sps:$4 sm:$0xff]  }
 0x3a1   : > { %3200 = vmatprep.subr.bf16.mxu1 %v4383_v20  ;;  %v4470_v20 = vld [vmem:[%s5376_s1 + $0x294] ss:$76 sps:$4 sm:$0xff]  }
 0x3a3   : > { %3160 = vmatpush1.bf16.msra.mxu0 %v4378_v21  ;;  %v4473_v21 = vld [vmem:[%s5376_s1 + $0x29c] ss:$76 sps:$4 sm:$0xff]  }
 0x3a4   : > { %3201 = vmatpush1.bf16.msra.mxu1 %v4381_v22  ;;  %3161 = vmatprep.subr.bf16.mxu0 %v4386_v23  ;;  %v4468_v22 = vld [vmem:[%s5376_s1 + $0x290] ss:$76 sps:$4 sm:$0xff]   ;;  %v4471_v23 = vld [vmem:[%s5376_s1 + $0x298] ss:$76 sps:$4 sm:$0xff]  }
 0x3a5   : > { %3202 = vmatprep.subr.bf16.mxu1 %v4389_v24  ;;  %v4476_v24 = vld [vmem:[%s5376_s1 + $0x32c] ss:$76 sps:$4 sm:$0xff]  }
 0x3a7   : > { %3162 = vmatpush1.bf16.msra.mxu0 %v4384_v25  ;;  %v4479_v25 = vld [vmem:[%s5376_s1 + $0x334] ss:$76 sps:$4 sm:$0xff]  }
 0x3a8   : > { %3203 = vmatpush1.bf16.msra.mxu1 %v4387_v26  ;;  %3163 = vmatprep.subr.bf16.mxu0 %v4392_v27  ;;  %v4474_v26 = vld [vmem:[%s5376_s1 + $0x328] ss:$76 sps:$4 sm:$0xff]   ;;  %v4477_v27 = vld [vmem:[%s5376_s1 + $0x330] ss:$76 sps:$4 sm:$0xff]  }
 0x3a9   : > { %3204 = vmatprep.subr.bf16.mxu1 %v4395_v28  ;;  %v4482_v28 = vld [vmem:[%s5376_s1 + $0x3c4] ss:$76 sps:$4 sm:$0xff]  }
 0x3ab   : > { %3164 = vmatpush1.bf16.msra.mxu0 %v4390_v29  ;;  %v4485_v29 = vld [vmem:[%s5376_s1 + $0x3cc] ss:$76 sps:$4 sm:$0xff]  }
 0x3ac   : > { %3205 = vmatpush1.bf16.msra.mxu1 %v4393_v30  ;;  %3165 = vmatprep.subr.bf16.mxu0 %v4398_v31  ;;  %v4480_v30 = vld [vmem:[%s5376_s1 + $0x3c0] ss:$76 sps:$4 sm:$0xff]   ;;  %v4483_v31 = vld [vmem:[%s5376_s1 + $0x3c8] ss:$76 sps:$4 sm:$0xff]  }
 0x3ad   : > { %3206 = vmatprep.subr.bf16.mxu1 %v4401_v32  ;;  %v4488_v32 = vld [vmem:[%s5376_s1 + $0x45c] ss:$76 sps:$4 sm:$0xff]  }
 0x3af   : > { %3166 = vmatpush1.bf16.msra.mxu0 %v4396_v33  ;;  %v4491_v33 = vld [vmem:[%s5376_s1 + $0x464] ss:$76 sps:$4 sm:$0xff]  }
 0x3b0   : > { %3207 = vmatpush1.bf16.msra.mxu1 %v4399_v34  ;;  %3167 = vmatprep.subr.bf16.mxu0 %v4404_v35  ;;  %v4486_v34 = vld [vmem:[%s5376_s1 + $0x458] ss:$76 sps:$4 sm:$0xff]   ;;  %v4489_v35 = vld [vmem:[%s5376_s1 + $0x460] ss:$76 sps:$4 sm:$0xff]  }
 0x3b1   : > { %3208 = vmatprep.subr.bf16.mxu1 %v4407_v36  ;;  %v4494_v36 = vld [vmem:[%s5376_s1 + $0x4f4] ss:$76 sps:$4 sm:$0xff]  }
 0x3b3   : > { %3168 = vmatpush1.bf16.msra.mxu0 %v4402_v37  ;;  %v4497_v37 = vld [vmem:[%s5376_s1 + $0x4fc] ss:$76 sps:$4 sm:$0xff]  }
 0x3b4   : > { %3209 = vmatpush1.bf16.msra.mxu1 %v4405_v38  ;;  %3169 = vmatprep.subr.bf16.mxu0 %v4410_v39  ;;  %v4492_v38 = vld [vmem:[%s5376_s1 + $0x4f0] ss:$76 sps:$4 sm:$0xff]   ;;  %v4495_v39 = vld [vmem:[%s5376_s1 + $0x4f8] ss:$76 sps:$4 sm:$0xff]  }
 0x3b5   : > { %3210 = vmatprep.subr.bf16.mxu1 %v4413_v40  ;;  %v4500_v40 = vld [vmem:[%s5376_s1 + $0x58c] ss:$76 sps:$4 sm:$0xff]  }
 0x3b7   : > { %3170 = vmatpush1.bf16.msra.mxu0 %v4408_v41  ;;  %v4503_v41 = vld [vmem:[%s5376_s1 + $0x594] ss:$76 sps:$4 sm:$0xff]  }
 0x3b8   : > { %3211 = vmatpush1.bf16.msra.mxu1 %v4411_v42  ;;  %3171 = vmatprep.subr.bf16.mxu0 %v4416_v43  ;;  %v4498_v42 = vld [vmem:[%s5376_s1 + $0x588] ss:$76 sps:$4 sm:$0xff]   ;;  %v4501_v43 = vld [vmem:[%s5376_s1 + $0x590] ss:$76 sps:$4 sm:$0xff]  }
 0x3b9   : > { %3212 = vmatprep.subr.bf16.mxu1 %v4419_v44  ;;  %v4506_v44 = vld [vmem:[%s5376_s1 + $0x624] ss:$76 sps:$4 sm:$0xff]  }
 0x3bb   : > { %3172 = vmatpush1.bf16.msra.mxu0 %v4414_v45  ;;  %v4509_v45 = vld [vmem:[%s5376_s1 + $0x62c] ss:$76 sps:$4 sm:$0xff]  }
 0x3bc   : > { %3213 = vmatpush1.bf16.msra.mxu1 %v4417_v46  ;;  %3173 = vmatprep.subr.bf16.mxu0 %v4422_v47  ;;  %v4504_v46 = vld [vmem:[%s5376_s1 + $0x620] ss:$76 sps:$4 sm:$0xff]   ;;  %v4507_v47 = vld [vmem:[%s5376_s1 + $0x628] ss:$76 sps:$4 sm:$0xff]  }
 0x3bd   : > { %3214 = vmatprep.subr.bf16.mxu1 %v4425_v48  ;;  %v4512_v48 = vld [vmem:[%s5376_s1 + $0x6bc] ss:$76 sps:$4 sm:$0xff]  }
 0x3bf   : > { %3174 = vmatpush1.bf16.msra.mxu0 %v4420_v49  ;;  %v4515_v49 = vld [vmem:[%s5376_s1 + $0x6c4] ss:$76 sps:$4 sm:$0xff]  }
 0x3c0   : > { %3215 = vmatpush1.bf16.msra.mxu1 %v4423_v50  ;;  %3175 = vmatprep.subr.bf16.mxu0 %v4428_v53  ;;  %v4510_v50 = vld [vmem:[%s5376_s1 + $0x6b8] ss:$76 sps:$4 sm:$0xff]   ;;  %v4513_v53 = vld [vmem:[%s5376_s1 + $0x6c0] ss:$76 sps:$4 sm:$0xff]  }
 0x3c1   : > { %3216 = vmatprep.subr.bf16.mxu1 %v4431_v55  ;;  %v4518_v55 = vld [vmem:[%s5376_s1 + $0x754] ss:$76 sps:$4 sm:$0xff]  }
 0x3c3   : > { %3176 = vmatpush1.bf16.msra.mxu0 %v4426_v56  ;;  %v4521_v56 = vld [vmem:[%s5376_s1 + $0x75c] ss:$76 sps:$4 sm:$0xff]  }
 0x3c4   : > { %3217 = vmatpush1.bf16.msra.mxu1 %v4429_v57  ;;  %3177 = vmatprep.subr.bf16.mxu0 %v4434_v59  ;;  %v4516_v57 = vld [vmem:[%s5376_s1 + $0x750] ss:$76 sps:$4 sm:$0xff]   ;;  %v4519_v59 = vld [vmem:[%s5376_s1 + $0x758] ss:$76 sps:$4 sm:$0xff]  }
 0x3c5   : > { %3218 = vmatprep.subr.bf16.mxu1 %v4437_v60  ;;  %v4524_v60 = vld [vmem:[%s5376_s1 + $0x7ec] ss:$76 sps:$4 sm:$0xff]  }
 0x3c7   : > { %3178 = vmatpush1.bf16.msra.mxu0 %v4432_v62  ;;  %v4527_v62 = vld [vmem:[%s5376_s1 + $0x7f4] ss:$76 sps:$4 sm:$0xff]  }
 0x3c8   : > { %3219 = vmatpush1.bf16.msra.mxu1 %v4435_v63  ;;  %3179 = vmatprep.subr.bf16.mxu0 %v4440_v0  ;;  %v4522_v63 = vld [vmem:[%s5376_s1 + $0x7e8] ss:$76 sps:$4 sm:$0xff]   ;;  %v4525_v0 = vld [vmem:[%s5376_s1 + $0x7f0] ss:$76 sps:$4 sm:$0xff]  }
 0x3c9   : > { %3220 = vmatprep.subr.bf16.mxu1 %v4443_v1  ;;  %v4530_v1 = vld [vmem:[%s5376_s1 + $0x884] ss:$76 sps:$4 sm:$0xff]  }
 0x3cb   : > { %3180 = vmatpush1.bf16.msra.mxu0 %v4438_v2  ;;  %v4533_v2 = vld [vmem:[%s5376_s1 + $0x88c] ss:$76 sps:$4 sm:$0xff]  }
 0x3cc   : > { %3221 = vmatpush1.bf16.msra.mxu1 %v4441_v3  ;;  %3231 = vmatprep.subr.bf16.mxu0 %v4446_v4  ;;  %v4528_v3 = vld [vmem:[%s5376_s1 + $0x880] ss:$76 sps:$4 sm:$0xff]   ;;  %v4531_v4 = vld [vmem:[%s5376_s1 + $0x888] ss:$76 sps:$4 sm:$0xff]  }
 0x3cd   : > { %3272 = vmatprep.subr.bf16.mxu1 %v4449_v5  ;;  %v4536_v5 = vld [vmem:[%s5376_s1 + $0x91c] ss:$76 sps:$4 sm:$0xff]  }
 0x3ce   : > { %3182 = vmatmul.mubr.bf16.vlgmr.msra.gmra.mrb[12].mxu0 %v5475_v61 }
 0x3cf   : > { %3223 = vmatmul.mubr.bf16.vlgmr.msra.gmra.mrb[12].mxu1 %v5475_v61  ;;  %3232 = vmatpush1.bf16.msra.mxu0 %v4444_v6  ;;  %v4539_v6 = vld [vmem:[%s5376_s1 + $0x924] ss:$76 sps:$4 sm:$0xff]  }
 0x3d0   : > { %3263 = vmatprep.mubr.bf16.mxu0 %v5471_v58  ;;  %3273 = vmatpush1.bf16.msra.mxu1 %v4447_v7  ;;  %v4534_v7 = vld [vmem:[%s5376_s1 + $0x918] ss:$76 sps:$4 sm:$0xff]  }
 0x3d1   : > { %3304 = vmatprep.mubr.bf16.mxu1 %v5471_v58  ;;  %3233 = vmatprep.subr.bf16.mxu0 %v4452_v8  ;;  %v4537_v8 = vld [vmem:[%s5376_s1 + $0x920] ss:$76 sps:$4 sm:$0xff]  }
 0x3d2   : > { %3274 = vmatprep.subr.bf16.mxu1 %v4455_v9  ;;  %v4542_v9 = vld [vmem:[%s5376_s1 + $0x44] ss:$76 sps:$4 sm:$0xff]  }
 0x3d3   : > { %3234 = vmatpush1.bf16.msra.mxu0 %v4450_v10  ;;  %v4543_v10 = vld [vmem:[%s5376_s1 + $0x508] ss:$76 sps:$4 sm:$0xff]  }
 0x3d4   : > { %3275 = vmatpush1.bf16.msra.mxu1 %v4453_v11  ;;  %3235 = vmatprep.subr.bf16.mxu0 %v4458_v12  ;;  %v4540_v11 = vld [vmem:[%s5376_s1 + $0x40] ss:$76 sps:$4 sm:$0xff]   ;;  %v4544_v12 = vld [vmem:[%s5376_s1 + $0x48] ss:$76 sps:$4 sm:$0xff]  }
 0x3d5   : > { %3276 = vmatprep.subr.bf16.mxu1 %v4461_v13  ;;  %v4547_v13 = vld [vmem:[%s5376_s1 + $0xdc] ss:$76 sps:$4 sm:$0xff]  }
 0x3d7   : > { %3236 = vmatpush1.bf16.msra.mxu0 %v4456_v14  ;;  %v4548_v14 = vld [vmem:[%s5376_s1 + $0x5a0] ss:$76 sps:$4 sm:$0xff]  }
 0x3d8   : > { %3277 = vmatpush1.bf16.msra.mxu1 %v4459_v15  ;;  %3237 = vmatprep.subr.bf16.mxu0 %v4464_v16  ;;  %v4545_v15 = vld [vmem:[%s5376_s1 + $0xd8] ss:$76 sps:$4 sm:$0xff]   ;;  %v4549_v16 = vld [vmem:[%s5376_s1 + $0xe0] ss:$76 sps:$4 sm:$0xff]  }
 0x3d9   : > { %3278 = vmatprep.subr.bf16.mxu1 %v4467_v17  ;;  %v4552_v17 = vld [vmem:[%s5376_s1 + $0x174] ss:$76 sps:$4 sm:$0xff]  }
 0x3db   : > { %3238 = vmatpush1.bf16.msra.mxu0 %v4462_v18  ;;  %v4553_v18 = vld [vmem:[%s5376_s1 + $0x638] ss:$76 sps:$4 sm:$0xff]  }
 0x3dc   : > { %3279 = vmatpush1.bf16.msra.mxu1 %v4465_v19  ;;  %3239 = vmatprep.subr.bf16.mxu0 %v4470_v20  ;;  %v4550_v19 = vld [vmem:[%s5376_s1 + $0x170] ss:$76 sps:$4 sm:$0xff]   ;;  %v4554_v20 = vld [vmem:[%s5376_s1 + $0x178] ss:$76 sps:$4 sm:$0xff]  }
 0x3dd   : > { %3280 = vmatprep.subr.bf16.mxu1 %v4473_v21  ;;  %v4557_v21 = vld [vmem:[%s5376_s1 + $0x20c] ss:$76 sps:$4 sm:$0xff]  }
 0x3df   : > { %3240 = vmatpush1.bf16.msra.mxu0 %v4468_v22  ;;  %v4558_v22 = vld [vmem:[%s5376_s1 + $0x6d0] ss:$76 sps:$4 sm:$0xff]  }
 0x3e0   : > { %3281 = vmatpush1.bf16.msra.mxu1 %v4471_v23  ;;  %3241 = vmatprep.subr.bf16.mxu0 %v4476_v24  ;;  %v4559_v23 = vld [vmem:[%s5376_s1 + $0x210] ss:$76 sps:$4 sm:$0xff]  }
 0x3e1   : > { %3282 = vmatprep.subr.bf16.mxu1 %v4479_v25  ;;  %v4562_v24 = vld [vmem:[%s5376_s1 + $0x2a4] ss:$76 sps:$4 sm:$0xff]   ;;  %v4563_v25 = vld [vmem:[%s5376_s1 + $0x768] ss:$76 sps:$4 sm:$0xff]  }
 0x3e3   : > { %3242 = vmatpush1.bf16.msra.mxu0 %v4474_v26  ;;  %v5705_v26 = vsub.s32 2, %v5396_v51 }
 0x3e4   : > { %3283 = vmatpush1.bf16.msra.mxu1 %v4477_v27  ;;  %3243 = vmatprep.subr.bf16.mxu0 %v4482_v28  ;;  %v4560_v27 = vld [vmem:[%s5376_s1 + $0x2a0] ss:$76 sps:$4 sm:$0xff]  }
 0x3e5   : > { %3284 = vmatprep.subr.bf16.mxu1 %v4485_v29  ;;  %v5711_v28 = vld [vmem:[%s5708_s23] sm:$0xff]  ;;  %v1368_v29 = vsub.s32 3, %v5396_v51 }
 0x3e7   : > { %3244 = vmatpush1.bf16.msra.mxu0 %v4480_v30  ;;  %v4564_v30 = vld [vmem:[%s5376_s1 + $0x2a8] ss:$76 sps:$4 sm:$0xff]  }
 0x3e8   : > { %3285 = vmatpush1.bf16.msra.mxu1 %v4483_v31  ;;  %3245 = vmatprep.subr.bf16.mxu0 %v4488_v32  ;;  %v4567_v31 = vld [vmem:[%s5376_s1 + $0x33c] ss:$76 sps:$4 sm:$0xff]   ;;  %v4568_v32 = vld [vmem:[%s5376_s1 + $0x800] ss:$76 sps:$4 sm:$0xff]  }
 0x3e9   : > { %3286 = vmatprep.subr.bf16.mxu1 %v4491_v33  ;;  %v1357_v33 = vrot.slane %v5711_v28, %v5399_v52 }
 0x3eb   : > { %3246 = vmatpush1.bf16.msra.mxu0 %v4486_v34  ;;  %v1365_v34 = vrot.slane %v5711_v28, %v5705_v26 }
 0x3ec   : > { %3287 = vmatpush1.bf16.msra.mxu1 %v4489_v35  ;;  %3247 = vmatprep.subr.bf16.mxu0 %v4494_v36  ;;  %v4565_v35 = vld [vmem:[%s5376_s1 + $0x338] ss:$76 sps:$4 sm:$0xff]   ;;  %v1361_v36 = vrot.slane %v5711_v28, %v5402_v54 }
 0x3ed   : > { %3288 = vmatprep.subr.bf16.mxu1 %v4497_v37  ;;  %v1369_v37 = vrot.slane %v5711_v28, %v1368_v29 }
 0x3ef   : > { %3248 = vmatpush1.bf16.msra.mxu0 %v4492_v38  ;;  %v4569_v38 = vld [vmem:[%s5376_s1 + $0x340] ss:$76 sps:$4 sm:$0xff]  }
 0x3f0   : > { %3289 = vmatpush1.bf16.msra.mxu1 %v4495_v39  ;;  %3249 = vmatprep.subr.bf16.mxu0 %v4500_v40  ;;  %v4572_v39 = vld [vmem:[%s5376_s1 + $0x3d4] ss:$76 sps:$4 sm:$0xff]  }
 0x3f1   : > { %3290 = vmatprep.subr.bf16.mxu1 %v4503_v41 }
 0x3f3   : > { %3250 = vmatpush1.bf16.msra.mxu0 %v4498_v42  ;;  %v4573_v42 = vld [vmem:[%s5376_s1 + $0x898] ss:$76 sps:$4 sm:$0xff]  }
 0x3f4   : > { %3291 = vmatpush1.bf16.msra.mxu1 %v4501_v43  ;;  %3251 = vmatprep.subr.bf16.mxu0 %v4506_v44 }
 0x3f5   : > { %3292 = vmatprep.subr.bf16.mxu1 %v4509_v45 }
 0x3f7   : > { %3252 = vmatpush1.bf16.msra.mxu0 %v4504_v46 }
 0x3f8   : > { %3293 = vmatpush1.bf16.msra.mxu1 %v4507_v47  ;;  %3253 = vmatprep.subr.bf16.mxu0 %v4512_v48 }
 0x3f9   : > { %3294 = vmatprep.subr.bf16.mxu1 %v4515_v49 }
 0x3fb   : > { %3254 = vmatpush1.bf16.msra.mxu0 %v4510_v50 }
 0x3fc   : > { %3295 = vmatpush1.bf16.msra.mxu1 %v4513_v53  ;;  %3255 = vmatprep.subr.bf16.mxu0 %v4518_v55  ;;  %v4570_v53 = vld [vmem:[%s5376_s1 + $0x3d0] ss:$76 sps:$4 sm:$0xff]  }
 0x3fd   : > { %3296 = vmatprep.subr.bf16.mxu1 %v4521_v56 }
 0x3ff   : > { %3256 = vmatpush1.bf16.msra.mxu0 %v4516_v57  ;;  %v4574_v57 = vld [vmem:[%s5376_s1 + $0x3d8] ss:$76 sps:$4 sm:$0xff]  }
 0x400   : > { %3297 = vmatpush1.bf16.msra.mxu1 %v4519_v59  ;;  %3257 = vmatprep.subr.bf16.mxu0 %v4524_v60  ;;  %v4577_v59 = vld [vmem:[%s5376_s1 + $0x46c] ss:$76 sps:$4 sm:$0xff]   ;;  %v4578_v60 = vld [vmem:[%s5376_s1 + $0x930] ss:$76 sps:$4 sm:$0xff]  }
 0x401   : > { %3298 = vmatprep.subr.bf16.mxu1 %v4527_v62  ;;  %v4575_v62 = vld [vmem:[%s5376_s1 + $0x468] ss:$76 sps:$4 sm:$0xff]  }
 0x403   : > { %3258 = vmatpush1.bf16.msra.mxu0 %v4522_v63  ;;  %v4579_v63 = vld [vmem:[%s5376_s1 + $0x470] ss:$76 sps:$4 sm:$0xff]  }
 0x404   : > { %3299 = vmatpush1.bf16.msra.mxu1 %v4525_v0  ;;  %3259 = vmatprep.subr.bf16.mxu0 %v4530_v1  ;;  %v4582_v0 = vld [vmem:[%s5376_s1 + $0x504] ss:$76 sps:$4 sm:$0xff]   ;;  %v4580_v1 = vld [vmem:[%s5376_s1 + $0x500] ss:$76 sps:$4 sm:$0xff]  }
 0x405   : > { %3300 = vmatprep.subr.bf16.mxu1 %v4533_v2  ;;  %v4585_v2 = vld [vmem:[%s5376_s1 + $0x59c] ss:$76 sps:$4 sm:$0xff]  }
 0x407   : > { %3260 = vmatpush1.bf16.msra.mxu0 %v4528_v3  ;;  %v4583_v3 = vld [vmem:[%s5376_s1 + $0x598] ss:$76 sps:$4 sm:$0xff]  }
 0x408   : > { %3301 = vmatpush1.bf16.msra.mxu1 %v4531_v4  ;;  %3261 = vmatprep.subr.bf16.mxu0 %v4536_v5  ;;  %v4588_v4 = vld [vmem:[%s5376_s1 + $0x634] ss:$76 sps:$4 sm:$0xff]   ;;  %v4586_v5 = vld [vmem:[%s5376_s1 + $0x630] ss:$76 sps:$4 sm:$0xff]  }
 0x409   : > { %3302 = vmatprep.subr.bf16.mxu1 %v4539_v6  ;;  %v4591_v6 = vld [vmem:[%s5376_s1 + $0x6cc] ss:$76 sps:$4 sm:$0xff]  }
 0x40b   : > { %3262 = vmatpush1.bf16.msra.mxu0 %v4534_v7  ;;  %v4589_v7 = vld [vmem:[%s5376_s1 + $0x6c8] ss:$76 sps:$4 sm:$0xff]  }
 0x40c   : > { %3303 = vmatpush1.bf16.msra.mxu1 %v4537_v8  ;;  %3313 = vmatprep.subr.bf16.mxu0 %v4542_v9  ;;  %v4594_v8 = vld [vmem:[%s5376_s1 + $0x764] ss:$76 sps:$4 sm:$0xff]   ;;  %v4592_v9 = vld [vmem:[%s5376_s1 + $0x760] ss:$76 sps:$4 sm:$0xff]  }
 0x40d   : > { %3945 = vmatprep.subr.bf16.mxu1 %v4543_v10  ;;  %v4597_v10 = vld [vmem:[%s5376_s1 + $0x7fc] ss:$76 sps:$4 sm:$0xff]  }
 0x40e   : > { %3264 = vmatmul.mubr.bf16.vlgmr.msra.gmra.mrb[16].mxu0 %v5475_v61 }
 0x40f   : > { %3305 = vmatmul.mubr.bf16.vlgmr.msra.gmra.mrb[16].mxu1 %v5475_v61  ;;  %3314 = vmatpush1.bf16.msra.mxu0 %v4540_v11  ;;  %v4595_v11 = vld [vmem:[%s5376_s1 + $0x7f8] ss:$76 sps:$4 sm:$0xff]  }
 0x410   : > { %3345 = vmatprep.mubr.bf16.mxu0 %v5471_v58  ;;  %3946 = vmatpush3.bf16.msra.mxu1 %v4544_v12  ;;  %v4600_v12 = vld [vmem:[%s5376_s1 + $0x894] ss:$76 sps:$4 sm:$0xff]  }
 0x411   : > { %3386 = vmatprep.mubr.bf16.mxu1 %v5471_v58  ;;  %3315 = vmatprep.subr.bf16.mxu0 %v4547_v13  ;;  %v4555_v58 = vld [vmem:[%s5376_s1 + $0x208] ss:$76 sps:$4 sm:$0xff]   ;;  %v4598_v13 = vld [vmem:[%s5376_s1 + $0x890] ss:$76 sps:$4 sm:$0xff]  }
 0x412   : > { %3947 = vmatprep.subr.bf16.mxu1 %v4548_v14  ;;  %v4603_v14 = vld [vmem:[%s5376_s1 + $0x92c] ss:$76 sps:$4 sm:$0xff]  }
 0x413   : > { %3316 = vmatpush1.bf16.msra.mxu0 %v4545_v15  ;;  %v4601_v15 = vld [vmem:[%s5376_s1 + $0x928] ss:$76 sps:$4 sm:$0xff]  }
 0x414   : > { %3948 = vmatpush3.bf16.msra.mxu1 %v4549_v16  ;;  %3317 = vmatprep.subr.bf16.mxu0 %v4552_v17  ;;  %v1372_v16 = vsub.s32 4, %v5396_v51  ;;  %v1380_v17 = vsub.s32 6, %v5396_v51 }
 0x415   : > { %3949 = vmatprep.subr.bf16.mxu1 %v4553_v18  ;;  %v1376_v18 = vsub.s32 5, %v5396_v51 }
 0x417   : > { %3318 = vmatpush1.bf16.msra.mxu0 %v4550_v19  ;;  %v1384_v19 = vsub.s32 7, %v5396_v51 }
 0x418   : > { %3950 = vmatpush3.bf16.msra.mxu1 %v4554_v20  ;;  %3319 = vmatprep.subr.bf16.mxu0 %v4557_v21  ;;  %v1373_v20 = vrot.slane %v5711_v28, %v1372_v16  ;;  %v1381_v21 = vrot.slane %v5711_v28, %v1380_v17 }
 0x419   : > { %3951 = vmatprep.subr.bf16.mxu1 %v4558_v22  ;;  %v1377_v22 = vrot.slane %v5711_v28, %v1376_v18 }
 0x41b   : > { %3320 = vmatpush1.bf16.msra.mxu0 %v4555_v58  ;;  %v1385_v58 = vrot.slane %v5711_v28, %v1384_v19  ;;  %v1349_v28 = vld [vmem:[%s5708_s23 + $0x8] sm:$0xff] }
 0x41c   : > { %3952 = vmatpush3.bf16.msra.mxu1 %v4559_v23  ;;  %3321 = vmatprep.subr.bf16.mxu0 %v4562_v24  ;;  %v1405_v51 = vrot.slane %v1349_v28, %v1372_v16 }
 0x41d   : > { %3953 = vmatprep.subr.bf16.mxu1 %v4563_v25 }
 0x41f   : > { %3322 = vmatpush1.bf16.msra.mxu0 %v4560_v27 }
 0x420   : > { %3954 = vmatpush3.bf16.msra.mxu1 %v4564_v30  ;;  %3323 = vmatprep.subr.bf16.mxu0 %v4567_v31 }
 0x421   : > { %v3019_v40 = vpop.f32.mrb[4].mxu0  ;;  %v3060_v41 = vpop.f32.mrb[4].mxu1  ;;  %3955 = vmatprep.subr.bf16.mxu1 %v4568_v32 }
 0x422   : > { %v3020_v43 = vadd.f32 %v3019_v40, %v1357_v33  ;;  %v3061_v44 = vadd.f32 %v3060_v41, %v1365_v34  ;;  %v3021_v45 = vpop.f32.mrb[5].mxu0  ;;  %v3062_v46 = vpop.f32.mrb[5].mxu1  ;;  %v1401_v40 = vrot.slane %v1349_v28, %v1368_v29  ;;  %v1413_v29 = vrot.slane %v1349_v28, %v1380_v17 }
 0x423   : > { %v3022_v47 = vadd.f32 %v3021_v45, %v1361_v36  ;;  %v3063_v48 = vadd.f32 %v3062_v46, %v1369_v37  ;;  %3324 = vmatpush1.bf16.msra.mxu0 %v4565_v35  ;;  %v3023_v49 = vpop.f32.mrb[6].mxu0  ;;  %v3064_v50 = vpop.f32.mrb[6].mxu1  ;;  %v1389_v37 = vrot.slane %v1349_v28, %v5399_v52 }
 0x424   : > { %3394 = vst [vmem:[%s5732_s26] sm:$0xff] %v3020_v43  ;;  %3396 = vst [vmem:[%s5732_s26 + $0x10] sm:$0xff] %v3061_v44  ;;  %3956 = vmatpush3.bf16.msra.mxu1 %v4569_v38  ;;  %v3024_v55 = vpop.f32.mrb[7].mxu0  ;;  %v3065_v56 = vpop.f32.mrb[7].mxu1  ;;  %3325 = vmatprep.subr.bf16.mxu0 %v4572_v39  ;;  %v1397_v38 = vrot.slane %v1349_v28, %v5705_v26  ;;  %v1393_v39 = vrot.slane %v1349_v28, %v5402_v54 }
 0x425   : > { %3395 = vst [vmem:[%s5732_s26 + $0x8] sm:$0xff] %v3022_v47  ;;  %3397 = vst [vmem:[%s5732_s26 + $0x18] sm:$0xff] %v3063_v48  ;;  %3957 = vmatprep.subr.bf16.mxu1 %v4573_v42  ;;  %v1409_v56 = vrot.slane %v1349_v28, %v1376_v18 }
 0x427   : > { %3326 = vmatpush1.bf16.msra.mxu0 %v4570_v53 }
 0x428   : > { %3958 = vmatpush3.bf16.msra.mxu1 %v4574_v57  ;;  %3327 = vmatprep.subr.bf16.mxu0 %v4577_v59  ;;  %v1417_v57 = vrot.slane %v1349_v28, %v1384_v19 }
 0x429   : > { %3959 = vmatprep.subr.bf16.mxu1 %v4578_v60 }
 0x42b   : > { %3328 = vmatpush1.bf16.msra.mxu0 %v4575_v62 }
 0x42c   : > { %3960 = vmatpush3.bf16.msra.mxu1 %v4579_v63  ;;  %3329 = vmatprep.subr.bf16.mxu0 %v4582_v0 }
 0x42f   : > { %3387 = vmatmul.mubr.bf16.vlgmr.msra.gmra.mrb[20].mxu1 %v5475_v61  ;;  %3330 = vmatpush1.bf16.msra.mxu0 %v4580_v1 }
 0x430   : > { %3331 = vmatprep.subr.bf16.mxu0 %v4585_v2 }
 0x433   : > { %3332 = vmatpush1.bf16.msra.mxu0 %v4583_v3 }
 0x434   : > { %3333 = vmatprep.subr.bf16.mxu0 %v4588_v4 }
 0x437   : > { %3334 = vmatpush1.bf16.msra.mxu0 %v4586_v5 }
 0x438   : > { %3335 = vmatprep.subr.bf16.mxu0 %v4591_v6 }
 0x43b   : > { %3336 = vmatpush1.bf16.msra.mxu0 %v4589_v7 }
 0x43c   : > { %3337 = vmatprep.subr.bf16.mxu0 %v4594_v8  ;;  %v1350_v8 = vld [vmem:[%s5708_s23 + $0x10] sm:$0x7] }
 0x43d   : > { %v1421_v16 = vrot.slane %v1350_v8, %v5399_v52  ;;  %v1425_v17 = vrot.slane %v1350_v8, %v5402_v54 }
 0x43f   : > { %3338 = vmatpush1.bf16.msra.mxu0 %v4592_v9 }
 0x440   : > { %3339 = vmatprep.subr.bf16.mxu0 %v4597_v10  ;;  %v1429_v10 = vrot.slane %v1350_v8, %v5705_v26 }
 0x443   : > { %3340 = vmatpush1.bf16.msra.mxu0 %v4595_v11 }
 0x444   : > { %3341 = vmatprep.subr.bf16.mxu0 %v4600_v12 }
 0x447   : > { %3342 = vmatpush1.bf16.msra.mxu0 %v4598_v13 }
 0x448   : > { %3343 = vmatprep.subr.bf16.mxu0 %v4603_v14 }
 0x44b   : > { %3344 = vmatpush1.bf16.msra.mxu0 %v4601_v15 }
 0x44e   : > { %3346 = vmatmul.mubr.bf16.vlgmr.msra.gmra.mrb[20].mxu0 %v5475_v61 }
 0x461   : > { %v3101_v61 = vpop.f32.mrb[8].mxu0  ;;  %v3142_v23 = vpop.f32.mrb[8].mxu1 }
 0x462   : > { %v3102_v24 = vadd.f32 %v3101_v61, %v1373_v20  ;;  %v3143_v25 = vadd.f32 %v3142_v23, %v1381_v21  ;;  %v3103_v27 = vpop.f32.mrb[9].mxu0  ;;  %v3144_v30 = vpop.f32.mrb[9].mxu1 }
 0x463   : > { %v3104_v31 = vadd.f32 %v3103_v27, %v1377_v22  ;;  %v3145_v32 = vadd.f32 %v3144_v30, %v1385_v58  ;;  %v3105_v33 = vpop.f32.mrb[10].mxu0  ;;  %v3146_v34 = vpop.f32.mrb[10].mxu1 }
 0x464   : > { %3398 = vst [vmem:[%s5732_s26 + $0x20] sm:$0xff] %v3102_v24  ;;  %3400 = vst [vmem:[%s5732_s26 + $0x30] sm:$0xff] %v3143_v25  ;;  %v3106_v35 = vpop.f32.mrb[11].mxu0  ;;  %v3147_v36 = vpop.f32.mrb[11].mxu1 }
 0x465   : > { %3399 = vst [vmem:[%s5732_s26 + $0x28] sm:$0xff] %v3104_v31  ;;  %3401 = vst [vmem:[%s5732_s26 + $0x38] sm:$0xff] %v3145_v32 }
 0x4a1   : > { %v3183_v41 = vpop.f32.mrb[12].mxu0 }
 0x4a2   : > { %v3184_v42 = vadd.f32 %v3183_v41, %v1389_v37  ;;  %v3224_v43 = vpop.f32.mrb[12].mxu1  ;;  %v3185_v44 = vpop.f32.mrb[13].mxu0 }
 0x4a3   : > { %v3225_v45 = vadd.f32 %v3224_v43, %v1397_v38  ;;  %v3186_v46 = vadd.f32 %v3185_v44, %v1393_v39  ;;  %v3226_v47 = vpop.f32.mrb[13].mxu1  ;;  %v3187_v48 = vpop.f32.mrb[14].mxu0 }
 0x4a4   : > { %3402 = vst [vmem:[%s5732_s26 + $0x40] sm:$0xff] %v3184_v42  ;;  %v3227_v49 = vadd.f32 %v3226_v47, %v1401_v40  ;;  %v3228_v50 = vpop.f32.mrb[14].mxu1  ;;  %v3188_v53 = vpop.f32.mrb[15].mxu0 }
 0x4a5   : > { %3404 = vst [vmem:[%s5732_s26 + $0x50] sm:$0xff] %v3225_v45  ;;  %3403 = vst [vmem:[%s5732_s26 + $0x48] sm:$0xff] %v3186_v46  ;;  %v3229_v55 = vpop.f32.mrb[15].mxu1 }
 0x4a6   : > { %3405 = vst [vmem:[%s5732_s26 + $0x58] sm:$0xff] %v3227_v49 }
 0x4e1   : > { %v3265_v59 = vpop.f32.mrb[16].mxu0 }
 0x4e2   : > { %v3266_v60 = vadd.f32 %v3265_v59, %v1405_v51  ;;  %v3306_v62 = vpop.f32.mrb[16].mxu1  ;;  %v3267_v63 = vpop.f32.mrb[17].mxu0 }
 0x4e3   : > { %v3307_v0 = vadd.f32 %v3306_v62, %v1413_v29  ;;  %v3268_v1 = vadd.f32 %v3267_v63, %v1409_v56  ;;  %v3308_v2 = vpop.f32.mrb[17].mxu1  ;;  %v3269_v3 = vpop.f32.mrb[18].mxu0 }
 0x4e4   : > { %3406 = vst [vmem:[%s5732_s26 + $0x60] sm:$0xff] %v3266_v60  ;;  %v3309_v4 = vadd.f32 %v3308_v2, %v1417_v57  ;;  %v3310_v5 = vpop.f32.mrb[18].mxu1  ;;  %v3270_v6 = vpop.f32.mrb[19].mxu0 }
 0x4e5   : > { %3408 = vst [vmem:[%s5732_s26 + $0x70] sm:$0xff] %v3307_v0  ;;  %3407 = vst [vmem:[%s5732_s26 + $0x68] sm:$0xff] %v3268_v1  ;;  %v3311_v7 = vpop.f32.mrb[19].mxu1 }
 0x4e6   : > { %3409 = vst [vmem:[%s5732_s26 + $0x78] sm:$0xff] %v3309_v4 }
 0x502   : > { %v3961_v9 = vpop.f32.mrb[20].mxu1 }
 0x503   : > { %v3962_v11 = vpop.f32.mrb[21].mxu1 }
 0x504   : > { %v3963_v12 = vadd.f32 %v3962_v11, %v3961_v9  ;;  %v3964_v13 = vpop.f32.mrb[22].mxu1 }
 0x505   : > { %v3965_v14 = vpop.f32.mrb[23].mxu1 }
 0x506   : > { %v3389_v15 = vadd.f32 %v3963_v12, %v1429_v10 }
 0x508   : > { %3412 = vst [vmem:[%s5732_s26 + $0x90] sm:$0xff] %v3389_v15 }
 0x521   : > { %v3347_v18 = vpop.f32.mrb[20].mxu0 }
 0x522   : > { %v3348_v19 = vadd.f32 %v3347_v18, %v1421_v16  ;;  %v3349_v20 = vpop.f32.mrb[21].mxu0 }
 0x523   : > { %v3350_v21 = vadd.f32 %v3349_v20, %v1425_v17  ;;  %v3351_v22 = vpop.f32.mrb[22].mxu0 }
 0x524   : > { %3410 = vst [vmem:[%s5732_s26 + $0x80] sm:$0xff] %v3348_v19  ;;  %v3352_v58 = vpop.f32.mrb[23].mxu0 }
 0x525   : > { %3411 = vst [vmem:[%s5732_s26 + $0x88] sm:$0xff] %v3350_v21 }
 0x526 PF: > { %p23_p9 = scmp.ge.s32.totalorder %s5169_s11, 4   ;;  %s5874_s17 = smov %s4942_s18 }
 0x527   : > { %s5875_s18 = smov %s4946_s19  ;;  %s5876_s19 = smov %s5181_s15 }
 0x528   : > { %s5877_s20 = smov %s5169_s11  ;;  %25 = sbr.rel (!%p23_p9) target bundleno = 14 (0xe), region = 146 }
 0x52f   :  { %3435 = vsyncpa [#allocation3], 1 }
 0x530   :  { %3437 = vsyncpa [#allocation3 + $0x1], 1 }
 0x531   :  { %3438 = vsyncpa [#allocation5], 1 }
 0x532   :  { %3439 = vsyncpa [#allocation8], 1 }
 0x533   :  { %3440 = vsyncpa [#allocation11], 1 }
 0x534   :  { %3441 = vsyncpa [#allocation14], 1 }

</bundles_post_ra>
